<compile_context>
chip_gen: v6e
topology: v6e:2x2x1
jax: 0.10.0
libtpu: 0.0.40
codegen_flags: <defaults>
</compile_context>

<pallas_src>
import functools

import jax
import jax.numpy as jnp
from jax import lax
from jax.experimental import pallas as pl
from jax.experimental.pallas import tpu as pltpu


# ----------------------------- Pallas kernel ------------------------------ #

def _hg_residual_kernel(row_ref, col_ref, x_ref,
                        w1sk_ref, s1sk_ref, b1sk_ref,
                        w2_ref, s2_ref, b2_ref,
                        w3_ref, s3_ref, b3_ref,
                        o_ref, patch_ref, *, H, W):
    n_out = o_ref.shape[1]
    c2 = s2_ref.shape[0]
    c3 = s3_ref.shape[0]
    c1 = n_out - c2 - c3

    # Boundary-validity masks for the 3x3 taps on the flattened (lane) axis.
    row = row_ref[...]                # (1, H*W) int32: y coordinate of lane p
    col = col_ref[...]                # (1, H*W) int32: x coordinate of lane p
    row_lo = row >= 1                 # tap dy = -1 is valid here
    row_hi = row <= H - 2             # tap dy = +1 is valid here
    col_lo = col >= 1                 # tap dx = -1 is valid here
    col_hi = col <= W - 2             # tap dx = +1 is valid here

    def write_patches(h):
        """Pack the 9 shifted+masked taps of h (C, H*W) into patch_ref[0:9C]."""
        ch = h.shape[0]
        for ky in range(3):
            dy = ky - 1
            for kx in range(3):
                dx = kx - 1
                shift = dy * W + dx
                t = h if shift == 0 else jnp.roll(h, -shift, axis=1)
                mask = None
                if dy == -1:
                    mask = row_lo
                elif dy == 1:
                    mask = row_hi
                if dx == -1:
                    mask = col_lo if mask is None else mask & col_lo
                elif dx == 1:
                    mask = col_hi if mask is None else mask & col_hi
                if mask is not None:
                    t = jnp.where(mask, t, 0.0)
                k = ky * 3 + kx
                patch_ref[k * ch:(k + 1) * ch, :] = t

    def conv_bn(w_ref, s_ref, b_ref):
        k_rows = w_ref.shape[1]       # = 9 * Cin of this conv
        y = jnp.dot(w_ref[...], patch_ref[0:k_rows, :],
                    preferred_element_type=jnp.float32)
        return y * s_ref[...] + b_ref[...]

    x = x_ref[0].astype(jnp.float32)                       # (cin, H*W)

    # scale1 (Conv3x3 + BN + ReLU) fused with the 1x1 skip (its weights sit in
    # the centre-tap columns of w1sk), one MXU matmul for both.
    write_patches(x)
    y1 = conv_bn(w1sk_ref, s1sk_ref, b1sk_ref)             # (c1 + n_out, H*W)
    o1 = jnp.maximum(y1[0:c1, :], 0.0)                     # (c1, H*W)
    skip = y1[c1:c1 + n_out, :]                            # (n_out, H*W)

    # scale2 (Conv3x3 + BN + ReLU).
    write_patches(o1)
    o2 = jnp.maximum(conv_bn(w2_ref, s2_ref, b2_ref), 0.0)  # (c2, H*W)

    # scale3 (Conv3x3 + BN, no activation).
    write_patches(o2)
    o3 = conv_bn(w3_ref, s3_ref, b3_ref)                    # (c3, H*W)

    # out = concat([o1, o2, o3], channel) + skip — written straight into the
    # channel slices of the lane-dense output block (no concat temp).
    o_ref[0, 0:c1, :] = (o1 + skip[0:c1, :]).astype(o_ref.dtype)
    o_ref[0, c1:c1 + c2, :] = (o2 + skip[c1:c1 + c2, :]).astype(o_ref.dtype)
    o_ref[0, c1 + c2:n_out, :] = (o3 + skip[c1 + c2:n_out, :]).astype(o_ref.dtype)


# ------------------------------- Wrapper ----------------------------------- #

def multiscale_hg_residual(x_nchw, params):
    N, cin, H, W = x_nchw.shape
    HW = H * W
    c1 = params["s1"].shape[0]
    c2 = params["s2"].shape[0]
    c3 = params["s3"].shape[0]
    n_out = c1 + c2 + c3
    if cin == n_out:
        raise NotImplementedError("identity skip (n_inp == n_out) not implemented")

    x2d = x_nchw.reshape(N, cin, HW).astype(jnp.float32)    # NCHW -> (N, C, H*W)

    pos = jnp.arange(HW, dtype=jnp.int32)
    rows = (pos // W).reshape(1, HW)
    cols = (pos % W).reshape(1, HW)

    p = params
    k_max = 9 * max(cin, c1, c2)                            # patches scratch rows

    kernel = functools.partial(_hg_residual_kernel, H=H, W=W)
    out = pl.pallas_call(
        kernel,
        out_shape=jax.ShapeDtypeStruct((N, n_out, HW), jnp.float32),
        grid=(N,),
        in_specs=[
            pl.BlockSpec((1, HW), lambda n: (0, 0)),               # rows
            pl.BlockSpec((1, HW), lambda n: (0, 0)),               # cols
            pl.BlockSpec((1, cin, HW), lambda n: (n, 0, 0)),       # x
            pl.BlockSpec(p["w1sk"].shape, lambda n: (0, 0)),
            pl.BlockSpec(p["s1sk"].shape, lambda n: (0, 0)),
            pl.BlockSpec(p["b1sk"].shape, lambda n: (0, 0)),
            pl.BlockSpec(p["w2m"].shape, lambda n: (0, 0)),
            pl.BlockSpec(p["s2m"].shape, lambda n: (0, 0)),
            pl.BlockSpec(p["b2m"].shape, lambda n: (0, 0)),
            pl.BlockSpec(p["w3m"].shape, lambda n: (0, 0)),
            pl.BlockSpec(p["s3m"].shape, lambda n: (0, 0)),
            pl.BlockSpec(p["b3m"].shape, lambda n: (0, 0)),
        ],
        out_specs=pl.BlockSpec((1, n_out, HW), lambda n: (n, 0, 0)),
        scratch_shapes=[pltpu.VMEM((k_max, HW), jnp.float32)],
        compiler_params=pltpu.CompilerParams(
            dimension_semantics=("parallel",)),
    )(rows, cols, x2d,
      p["w1sk"], p["s1sk"], p["b1sk"],
      p["w2m"], p["s2m"], p["b2m"],
      p["w3m"], p["s3m"], p["b3m"])

    return out.reshape(N, n_out, H, W)                      # (N, C, H*W) -> NCHW


# -------------------------- Parameter construction ------------------------- #

def _fold_bn(conv_b, gamma, beta, mean, var, eps=1e-5):
    s = gamma / jnp.sqrt(var + eps)
    b = (conv_b - mean) * s + beta
    return s.astype(jnp.float32), b.astype(jnp.float32)     # (cout,)


def _conv_bn_params(key, cin, cout, ksize):
    kw, kb, kg, kbe, km, kv = jax.random.split(key, 6)
    w = 0.1 * jax.random.normal(kw, (ksize, ksize, cin, cout), jnp.float32)  # HWIO
    conv_b = 0.05 * jax.random.normal(kb, (cout,), jnp.float32)
    gamma = 1.0 + 0.1 * jax.random.normal(kg, (cout,), jnp.float32)
    beta = 0.05 * jax.random.normal(kbe, (cout,), jnp.float32)
    mean = 0.05 * jax.random.normal(km, (cout,), jnp.float32)
    var = 1.0 + 0.1 * jax.random.uniform(kv, (cout,), jnp.float32)
    s, b = _fold_bn(conv_b, gamma, beta, mean, var)
    return w, s, b


def _pack3x3(w_hwio):
    kh, kw, cin, cout = w_hwio.shape
    # matmul LHS: (cout, 9*cin), columns ordered tap-major (k = ky*3+kx), then cin
    return jnp.asarray(w_hwio.reshape(kh * kw * cin, cout).T)


def make_params(key, n_inp, n_out):
    c1, c2 = n_out // 2, n_out // 4
    c3 = n_out - c1 - c2
    k1, k2, k3, k4 = jax.random.split(key, 4)
    w1, s1, b1 = _conv_bn_params(k1, n_inp, c1, 3)
    w2, s2, b2 = _conv_bn_params(k2, c1, c2, 3)
    w3, s3, b3 = _conv_bn_params(k3, c2, c3, 3)
    wsk, ssk, bsk = _conv_bn_params(k4, n_inp, n_out, 1)

    # Fuse the 1x1 skip conv into the scale1 matmul: its weights live in the
    # centre-tap (k = 4, i.e. dy = dx = 0) columns of the combined matrix.
    wm1 = _pack3x3(w1)                                      # (c1, 9*n_inp)
    wskm = jnp.zeros((n_out, 9 * n_inp), jnp.float32)
    wskm = wskm.at[:, 4 * n_inp:5 * n_inp].set(wsk[0, 0].T)  # (n_out, n_inp)
    w1sk = jnp.concatenate([wm1, wskm], axis=0)              # (c1 + n_out, 9*n_inp)
    s1sk = jnp.concatenate([s1, ssk]).reshape(-1, 1)
    b1sk = jnp.concatenate([b1, bsk]).reshape(-1, 1)

    return {
        # kernel-side packed tensors ((C, H*W)-layout matmul operands)
        "w1sk": w1sk, "s1sk": s1sk, "b1sk": b1sk,
        "w2m": _pack3x3(w2), "s2m": s2.reshape(-1, 1), "b2m": b2.reshape(-1, 1),
        "w3m": _pack3x3(w3), "s3m": s3.reshape(-1, 1), "b3m": b3.reshape(-1, 1),
        # reference-side tensors (HWIO weights, per-channel folded BN)
        "w1_hwio": w1, "s1": s1, "b1": b1,
        "w2_hwio": w2, "s2": s2, "b2": b2,
        "w3_hwio": w3, "s3": s3, "b3": b3,
        "wsk_hwio": wsk, "ssk": ssk, "bsk": bsk,
    }


# ----------------------------- Pure JAX reference --------------------------- #

def ref_forward(x_nchw, p):
    x = jnp.transpose(x_nchw, (0, 2, 3, 1)).astype(jnp.float32)   # NHWC

    def conv_bn(h, w_hwio, s, b, relu):
        y = lax.conv_general_dilated(h, w_hwio, (1, 1), "SAME",
                                     dimension_numbers=("NHWC", "HWIO", "NHWC"))
        y = y * s.reshape(1, 1, 1, -1) + b.reshape(1, 1, 1, -1)
        return jnp.maximum(y, 0.0) if relu else y

    o1 = conv_bn(x, p["w1_hwio"], p["s1"], p["b1"], True)
    o2 = conv_bn(o1, p["w2_hwio"], p["s2"], p["b2"], True)
    o3 = conv_bn(o2, p["w3_hwio"], p["s3"], p["b3"], False)
    skip = conv_bn(x, p["wsk_hwio"], p["ssk"], p["bsk"], False)
    out = jnp.concatenate([o1, o2, o3], axis=-1) + skip
    return jnp.transpose(out, (0, 3, 1, 2))


# ---------------------------------- Main ------------------------------------ #

if __name__ == "__main__":
    N, n_inp, n_out, H, W = 2, 4, 16, 16, 16

    key = jax.random.PRNGKey(0)
    kx, kp = jax.random.split(key)
    x = jax.random.normal(kx, (N, n_inp, H, W), jnp.float32)   # NCHW, like PyTorch
    params = make_params(kp, n_inp, n_out)

    out = jax.block_until_ready(multiscale_hg_residual(x, params))
    ref = jax.block_until_ready(ref_forward(x, params))

    assert out.shape == (N, n_out, H, W), out.shape
    assert jnp.allclose(out, ref, rtol=1e-3, atol=1e-3), (
        float(jnp.max(jnp.abs(out - ref))))

    print("KERNEL_OK")
</pallas_src>

<mosaic_0001>
module attributes {stable_mosaic.version = 11 : i64} {
  func.func @_hg_residual_kernel(%arg0: i32, %arg1: memref<1x256xi32, #tpu.memory_space<vmem>>, %arg2: memref<1x256xi32, #tpu.memory_space<vmem>>, %arg3: memref<1x4x256xf32, #tpu.memory_space<vmem>>, %arg4: memref<24x36xf32, #tpu.memory_space<vmem>>, %arg5: memref<24x1xf32, #tpu.memory_space<vmem>>, %arg6: memref<24x1xf32, #tpu.memory_space<vmem>>, %arg7: memref<4x72xf32, #tpu.memory_space<vmem>>, %arg8: memref<4x1xf32, #tpu.memory_space<vmem>>, %arg9: memref<4x1xf32, #tpu.memory_space<vmem>>, %arg10: memref<4x36xf32, #tpu.memory_space<vmem>>, %arg11: memref<4x1xf32, #tpu.memory_space<vmem>>, %arg12: memref<4x1xf32, #tpu.memory_space<vmem>>, %arg13: memref<1x16x256xf32, #tpu.memory_space<vmem>>, %arg14: memref<72x256xf32, #tpu.memory_space<vmem>>) attributes {dimension_semantics = [#tpu.dimension_semantics<parallel>], iteration_bounds = array<i64: 2>, scalar_prefetch = 0 : i64, scratch_operands = 1 : i64, tpu.core_type = #tpu.core_type<tc>, window_params = [{pipeline_mode = #tpu.pipeline_mode<synchronous>, transform_indices = @transform_0, window_bounds = array<i64: 1, 256>}, {pipeline_mode = #tpu.pipeline_mode<synchronous>, transform_indices = @transform_1, window_bounds = array<i64: 1, 256>}, {transform_indices = @transform_2, window_bounds = array<i64: 1, 4, 256>}, {pipeline_mode = #tpu.pipeline_mode<synchronous>, transform_indices = @transform_3, window_bounds = array<i64: 24, 36>}, {pipeline_mode = #tpu.pipeline_mode<synchronous>, transform_indices = @transform_4, window_bounds = array<i64: 24, 1>}, {pipeline_mode = #tpu.pipeline_mode<synchronous>, transform_indices = @transform_5, window_bounds = array<i64: 24, 1>}, {pipeline_mode = #tpu.pipeline_mode<synchronous>, transform_indices = @transform_6, window_bounds = array<i64: 4, 72>}, {pipeline_mode = #tpu.pipeline_mode<synchronous>, transform_indices = @transform_7, window_bounds = array<i64: 4, 1>}, {pipeline_mode = #tpu.pipeline_mode<synchronous>, transform_indices = @transform_8, window_bounds = array<i64: 4, 1>}, {pipeline_mode = #tpu.pipeline_mode<synchronous>, transform_indices = @transform_9, window_bounds = array<i64: 4, 36>}, {pipeline_mode = #tpu.pipeline_mode<synchronous>, transform_indices = @transform_10, window_bounds = array<i64: 4, 1>}, {pipeline_mode = #tpu.pipeline_mode<synchronous>, transform_indices = @transform_11, window_bounds = array<i64: 4, 1>}, {transform_indices = @transform_12, window_bounds = array<i64: 1, 16, 256>}]} {
    %c0 = arith.constant 0 : index
    %c0_0 = arith.constant 0 : index
    %0 = vector.load %arg1[%c0, %c0_0] : memref<1x256xi32, #tpu.memory_space<vmem>>, vector<1x256xi32>
    %c0_1 = arith.constant 0 : index
    %c0_2 = arith.constant 0 : index
    %1 = vector.load %arg2[%c0_1, %c0_2] : memref<1x256xi32, #tpu.memory_space<vmem>>, vector<1x256xi32>
    %c1_i32 = arith.constant 1 : i32
    %2 = vector.broadcast %c1_i32 : i32 to vector<1x256xi32>
    %3 = arith.cmpi sge, %0, %2 : vector<1x256xi32>
    %c14_i32 = arith.constant 14 : i32
    %4 = vector.broadcast %c14_i32 : i32 to vector<1x256xi32>
    %5 = arith.cmpi sle, %0, %4 : vector<1x256xi32>
    %c1_i32_3 = arith.constant 1 : i32
    %6 = vector.broadcast %c1_i32_3 : i32 to vector<1x256xi32>
    %7 = arith.cmpi sge, %1, %6 : vector<1x256xi32>
    %c14_i32_4 = arith.constant 14 : i32
    %8 = vector.broadcast %c14_i32_4 : i32 to vector<1x256xi32>
    %9 = arith.cmpi sle, %1, %8 : vector<1x256xi32>
    %c0_5 = arith.constant 0 : index
    %c0_6 = arith.constant 0 : index
    %c0_7 = arith.constant 0 : index
    %10 = vector.load %arg3[%c0_5, %c0_6, %c0_7] : memref<1x4x256xf32, #tpu.memory_space<vmem>>, vector<1x4x256xf32>
    %11 = vector.shape_cast %10 : vector<1x4x256xf32> to vector<4x256xf32>
    %12 = vector.extract_strided_slice %11 {offsets = [0, 239], sizes = [4, 17], strides = [1, 1]} : vector<4x256xf32> to vector<4x17xf32>
    %13 = vector.extract_strided_slice %11 {offsets = [0, 0], sizes = [4, 239], strides = [1, 1]} : vector<4x256xf32> to vector<4x239xf32>
    %14 = tpu.concatenate %12, %13 in 1 : vector<4x17xf32>, vector<4x239xf32> -> vector<4x256xf32>
    %15 = arith.andi %3, %7 : vector<1x256xi1>
    %cst = arith.constant 0.000000e+00 : f32
    %16 = vector.shape_cast %15 : vector<1x256xi1> to vector<1x256xi1>
    %17 = vector.broadcast %16 : vector<1x256xi1> to vector<4x256xi1>
    %18 = vector.broadcast %cst : f32 to vector<4x256xf32>
    %19 = arith.select %17, %14, %18 : vector<4x256xi1>, vector<4x256xf32>
    %c0_8 = arith.constant 0 : index
    %c0_9 = arith.constant 0 : index
    %20 = vector.load %arg14[%c0_8, %c0_9] : memref<72x256xf32, #tpu.memory_space<vmem>>, vector<4x256xf32>
    tpu.vector_store %arg14[%c0_8, %c0_9], %19 {strides = array<i32>} : memref<72x256xf32, #tpu.memory_space<vmem>>, vector<4x256xf32>,
    %21 = vector.extract_strided_slice %11 {offsets = [0, 240], sizes = [4, 16], strides = [1, 1]} : vector<4x256xf32> to vector<4x16xf32>
    %22 = vector.extract_strided_slice %11 {offsets = [0, 0], sizes = [4, 240], strides = [1, 1]} : vector<4x256xf32> to vector<4x240xf32>
    %23 = tpu.concatenate %21, %22 in 1 : vector<4x16xf32>, vector<4x240xf32> -> vector<4x256xf32>
    %cst_10 = arith.constant 0.000000e+00 : f32
    %24 = vector.shape_cast %3 : vector<1x256xi1> to vector<1x256xi1>
    %25 = vector.broadcast %24 : vector<1x256xi1> to vector<4x256xi1>
    %26 = vector.broadcast %cst_10 : f32 to vector<4x256xf32>
    %27 = arith.select %25, %23, %26 : vector<4x256xi1>, vector<4x256xf32>
    %c4 = arith.constant 4 : index
    %c0_11 = arith.constant 0 : index
    %28 = vector.load %arg14[%c4, %c0_11] : memref<72x256xf32, #tpu.memory_space<vmem>>, vector<4x256xf32>
    tpu.vector_store %arg14[%c4, %c0_11], %27 {strides = array<i32>} : memref<72x256xf32, #tpu.memory_space<vmem>>, vector<4x256xf32>,
    %29 = vector.extract_strided_slice %11 {offsets = [0, 241], sizes = [4, 15], strides = [1, 1]} : vector<4x256xf32> to vector<4x15xf32>
    %30 = vector.extract_strided_slice %11 {offsets = [0, 0], sizes = [4, 241], strides = [1, 1]} : vector<4x256xf32> to vector<4x241xf32>
    %31 = tpu.concatenate %29, %30 in 1 : vector<4x15xf32>, vector<4x241xf32> -> vector<4x256xf32>
    %32 = arith.andi %3, %9 : vector<1x256xi1>
    %cst_12 = arith.constant 0.000000e+00 : f32
    %33 = vector.shape_cast %32 : vector<1x256xi1> to vector<1x256xi1>
    %34 = vector.broadcast %33 : vector<1x256xi1> to vector<4x256xi1>
    %35 = vector.broadcast %cst_12 : f32 to vector<4x256xf32>
    %36 = arith.select %34, %31, %35 : vector<4x256xi1>, vector<4x256xf32>
    %c8 = arith.constant 8 : index
    %c0_13 = arith.constant 0 : index
    %37 = vector.load %arg14[%c8, %c0_13] : memref<72x256xf32, #tpu.memory_space<vmem>>, vector<4x256xf32>
    tpu.vector_store %arg14[%c8, %c0_13], %36 {strides = array<i32>} : memref<72x256xf32, #tpu.memory_space<vmem>>, vector<4x256xf32>,
    %38 = vector.extract_strided_slice %11 {offsets = [0, 255], sizes = [4, 1], strides = [1, 1]} : vector<4x256xf32> to vector<4x1xf32>
    %39 = vector.extract_strided_slice %11 {offsets = [0, 0], sizes = [4, 255], strides = [1, 1]} : vector<4x256xf32> to vector<4x255xf32>
    %40 = tpu.concatenate %38, %39 in 1 : vector<4x1xf32>, vector<4x255xf32> -> vector<4x256xf32>
    %cst_14 = arith.constant 0.000000e+00 : f32
    %41 = vector.shape_cast %7 : vector<1x256xi1> to vector<1x256xi1>
    %42 = vector.broadcast %41 : vector<1x256xi1> to vector<4x256xi1>
    %43 = vector.broadcast %cst_14 : f32 to vector<4x256xf32>
    %44 = arith.select %42, %40, %43 : vector<4x256xi1>, vector<4x256xf32>
    %c12 = arith.constant 12 : index
    %c0_15 = arith.constant 0 : index
    %45 = vector.load %arg14[%c12, %c0_15] : memref<72x256xf32, #tpu.memory_space<vmem>>, vector<4x256xf32>
    tpu.vector_store %arg14[%c12, %c0_15], %44 {strides = array<i32>} : memref<72x256xf32, #tpu.memory_space<vmem>>, vector<4x256xf32>,
    %c16 = arith.constant 16 : index
    %c0_16 = arith.constant 0 : index
    %46 = vector.load %arg14[%c16, %c0_16] : memref<72x256xf32, #tpu.memory_space<vmem>>, vector<4x256xf32>
    tpu.vector_store %arg14[%c16, %c0_16], %11 {strides = array<i32>} : memref<72x256xf32, #tpu.memory_space<vmem>>, vector<4x256xf32>,
    %47 = vector.extract_strided_slice %11 {offsets = [0, 1], sizes = [4, 255], strides = [1, 1]} : vector<4x256xf32> to vector<4x255xf32>
    %48 = vector.extract_strided_slice %11 {offsets = [0, 0], sizes = [4, 1], strides = [1, 1]} : vector<4x256xf32> to vector<4x1xf32>
    %49 = tpu.concatenate %47, %48 in 1 : vector<4x255xf32>, vector<4x1xf32> -> vector<4x256xf32>
    %cst_17 = arith.constant 0.000000e+00 : f32
    %50 = vector.shape_cast %9 : vector<1x256xi1> to vector<1x256xi1>
    %51 = vector.broadcast %50 : vector<1x256xi1> to vector<4x256xi1>
    %52 = vector.broadcast %cst_17 : f32 to vector<4x256xf32>
    %53 = arith.select %51, %49, %52 : vector<4x256xi1>, vector<4x256xf32>
    %c20 = arith.constant 20 : index
    %c0_18 = arith.constant 0 : index
    %54 = vector.load %arg14[%c20, %c0_18] : memref<72x256xf32, #tpu.memory_space<vmem>>, vector<4x256xf32>
    tpu.vector_store %arg14[%c20, %c0_18], %53 {strides = array<i32>} : memref<72x256xf32, #tpu.memory_space<vmem>>, vector<4x256xf32>,
    %55 = vector.extract_strided_slice %11 {offsets = [0, 15], sizes = [4, 241], strides = [1, 1]} : vector<4x256xf32> to vector<4x241xf32>
    %56 = vector.extract_strided_slice %11 {offsets = [0, 0], sizes = [4, 15], strides = [1, 1]} : vector<4x256xf32> to vector<4x15xf32>
    %57 = tpu.concatenate %55, %56 in 1 : vector<4x241xf32>, vector<4x15xf32> -> vector<4x256xf32>
    %58 = arith.andi %5, %7 : vector<1x256xi1>
    %cst_19 = arith.constant 0.000000e+00 : f32
    %59 = vector.shape_cast %58 : vector<1x256xi1> to vector<1x256xi1>
    %60 = vector.broadcast %59 : vector<1x256xi1> to vector<4x256xi1>
    %61 = vector.broadcast %cst_19 : f32 to vector<4x256xf32>
    %62 = arith.select %60, %57, %61 : vector<4x256xi1>, vector<4x256xf32>
    %c24 = arith.constant 24 : index
    %c0_20 = arith.constant 0 : index
    %63 = vector.load %arg14[%c24, %c0_20] : memref<72x256xf32, #tpu.memory_space<vmem>>, vector<4x256xf32>
    tpu.vector_store %arg14[%c24, %c0_20], %62 {strides = array<i32>} : memref<72x256xf32, #tpu.memory_space<vmem>>, vector<4x256xf32>,
    %64 = vector.extract_strided_slice %11 {offsets = [0, 16], sizes = [4, 240], strides = [1, 1]} : vector<4x256xf32> to vector<4x240xf32>
    %65 = vector.extract_strided_slice %11 {offsets = [0, 0], sizes = [4, 16], strides = [1, 1]} : vector<4x256xf32> to vector<4x16xf32>
    %66 = tpu.concatenate %64, %65 in 1 : vector<4x240xf32>, vector<4x16xf32> -> vector<4x256xf32>
    %cst_21 = arith.constant 0.000000e+00 : f32
    %67 = vector.shape_cast %5 : vector<1x256xi1> to vector<1x256xi1>
    %68 = vector.broadcast %67 : vector<1x256xi1> to vector<4x256xi1>
    %69 = vector.broadcast %cst_21 : f32 to vector<4x256xf32>
    %70 = arith.select %68, %66, %69 : vector<4x256xi1>, vector<4x256xf32>
    %c28 = arith.constant 28 : index
    %c0_22 = arith.constant 0 : index
    %71 = vector.load %arg14[%c28, %c0_22] : memref<72x256xf32, #tpu.memory_space<vmem>>, vector<4x256xf32>
    tpu.vector_store %arg14[%c28, %c0_22], %70 {strides = array<i32>} : memref<72x256xf32, #tpu.memory_space<vmem>>, vector<4x256xf32>,
    %72 = vector.extract_strided_slice %11 {offsets = [0, 17], sizes = [4, 239], strides = [1, 1]} : vector<4x256xf32> to vector<4x239xf32>
    %73 = vector.extract_strided_slice %11 {offsets = [0, 0], sizes = [4, 17], strides = [1, 1]} : vector<4x256xf32> to vector<4x17xf32>
    %74 = tpu.concatenate %72, %73 in 1 : vector<4x239xf32>, vector<4x17xf32> -> vector<4x256xf32>
    %75 = arith.andi %5, %9 : vector<1x256xi1>
    %cst_23 = arith.constant 0.000000e+00 : f32
    %76 = vector.shape_cast %75 : vector<1x256xi1> to vector<1x256xi1>
    %77 = vector.broadcast %76 : vector<1x256xi1> to vector<4x256xi1>
    %78 = vector.broadcast %cst_23 : f32 to vector<4x256xf32>
    %79 = arith.select %77, %74, %78 : vector<4x256xi1>, vector<4x256xf32>
    %c32 = arith.constant 32 : index
    %c0_24 = arith.constant 0 : index
    %80 = vector.load %arg14[%c32, %c0_24] : memref<72x256xf32, #tpu.memory_space<vmem>>, vector<4x256xf32>
    tpu.vector_store %arg14[%c32, %c0_24], %79 {strides = array<i32>} : memref<72x256xf32, #tpu.memory_space<vmem>>, vector<4x256xf32>,
    %c0_25 = arith.constant 0 : index
    %c0_26 = arith.constant 0 : index
    %81 = vector.load %arg4[%c0_25, %c0_26] : memref<24x36xf32, #tpu.memory_space<vmem>>, vector<24x36xf32>
    %c0_27 = arith.constant 0 : index
    %c0_28 = arith.constant 0 : index
    %82 = vector.load %arg14[%c0_27, %c0_28] : memref<72x256xf32, #tpu.memory_space<vmem>>, vector<36x256xf32>
    %cst_29 = arith.constant dense<0.000000e+00> : vector<24x256xf32>
    %83 = tpu.matmul %81, %82, %cst_29 {dimension_numbers = #tpu.dot_dimension_numbers<[1], [0], [0], [1], [0, 0, 1, 1], [], []>} : vector<24x36xf32>, vector<36x256xf32>, vector<24x256xf32> -> vector<24x256xf32>
    %c0_30 = arith.constant 0 : index
    %c0_31 = arith.constant 0 : index
    %84 = vector.load %arg5[%c0_30, %c0_31] : memref<24x1xf32, #tpu.memory_space<vmem>>, vector<24x1xf32>
    %85 = vector.broadcast %84 : vector<24x1xf32> to vector<24x256xf32>
    %86 = arith.mulf %83, %85 : vector<24x256xf32>
    %c0_32 = arith.constant 0 : index
    %c0_33 = arith.constant 0 : index
    %87 = vector.load %arg6[%c0_32, %c0_33] : memref<24x1xf32, #tpu.memory_space<vmem>>, vector<24x1xf32>
    %88 = vector.broadcast %87 : vector<24x1xf32> to vector<24x256xf32>
    %89 = arith.addf %86, %88 : vector<24x256xf32>
    %90 = vector.extract_strided_slice %89 {offsets = [0, 0], sizes = [8, 256], strides = [1, 1]} : vector<24x256xf32> to vector<8x256xf32>
    %cst_34 = arith.constant 0.000000e+00 : f32
    %91 = vector.broadcast %cst_34 : f32 to vector<8x256xf32>
    %92 = arith.maximumf %90, %91 : vector<8x256xf32>
    %93 = vector.extract_strided_slice %89 {offsets = [8, 0], sizes = [16, 256], strides = [1, 1]} : vector<24x256xf32> to vector<16x256xf32>
    %94 = vector.extract_strided_slice %92 {offsets = [0, 239], sizes = [8, 17], strides = [1, 1]} : vector<8x256xf32> to vector<8x17xf32>
    %95 = vector.extract_strided_slice %92 {offsets = [0, 0], sizes = [8, 239], strides = [1, 1]} : vector<8x256xf32> to vector<8x239xf32>
    %96 = tpu.concatenate %94, %95 in 1 : vector<8x17xf32>, vector<8x239xf32> -> vector<8x256xf32>
    %97 = arith.andi %3, %7 : vector<1x256xi1>
    %cst_35 = arith.constant 0.000000e+00 : f32
    %98 = vector.shape_cast %97 : vector<1x256xi1> to vector<1x256xi1>
    %99 = vector.broadcast %98 : vector<1x256xi1> to vector<8x256xi1>
    %100 = vector.broadcast %cst_35 : f32 to vector<8x256xf32>
    %101 = arith.select %99, %96, %100 : vector<8x256xi1>, vector<8x256xf32>
    %c0_36 = arith.constant 0 : index
    %c0_37 = arith.constant 0 : index
    %102 = vector.load %arg14[%c0_36, %c0_37] : memref<72x256xf32, #tpu.memory_space<vmem>>, vector<8x256xf32>
    tpu.vector_store %arg14[%c0_36, %c0_37], %101 {strides = array<i32>} : memref<72x256xf32, #tpu.memory_space<vmem>>, vector<8x256xf32>,
    %103 = vector.extract_strided_slice %92 {offsets = [0, 240], sizes = [8, 16], strides = [1, 1]} : vector<8x256xf32> to vector<8x16xf32>
    %104 = vector.extract_strided_slice %92 {offsets = [0, 0], sizes = [8, 240], strides = [1, 1]} : vector<8x256xf32> to vector<8x240xf32>
    %105 = tpu.concatenate %103, %104 in 1 : vector<8x16xf32>, vector<8x240xf32> -> vector<8x256xf32>
    %cst_38 = arith.constant 0.000000e+00 : f32
    %106 = vector.shape_cast %3 : vector<1x256xi1> to vector<1x256xi1>
    %107 = vector.broadcast %106 : vector<1x256xi1> to vector<8x256xi1>
    %108 = vector.broadcast %cst_38 : f32 to vector<8x256xf32>
    %109 = arith.select %107, %105, %108 : vector<8x256xi1>, vector<8x256xf32>
    %c8_39 = arith.constant 8 : index
    %c0_40 = arith.constant 0 : index
    %110 = vector.load %arg14[%c8_39, %c0_40] : memref<72x256xf32, #tpu.memory_space<vmem>>, vector<8x256xf32>
    tpu.vector_store %arg14[%c8_39, %c0_40], %109 {strides = array<i32>} : memref<72x256xf32, #tpu.memory_space<vmem>>, vector<8x256xf32>,
    %111 = vector.extract_strided_slice %92 {offsets = [0, 241], sizes = [8, 15], strides = [1, 1]} : vector<8x256xf32> to vector<8x15xf32>
    %112 = vector.extract_strided_slice %92 {offsets = [0, 0], sizes = [8, 241], strides = [1, 1]} : vector<8x256xf32> to vector<8x241xf32>
    %113 = tpu.concatenate %111, %112 in 1 : vector<8x15xf32>, vector<8x241xf32> -> vector<8x256xf32>
    %114 = arith.andi %3, %9 : vector<1x256xi1>
    %cst_41 = arith.constant 0.000000e+00 : f32
    %115 = vector.shape_cast %114 : vector<1x256xi1> to vector<1x256xi1>
    %116 = vector.broadcast %115 : vector<1x256xi1> to vector<8x256xi1>
    %117 = vector.broadcast %cst_41 : f32 to vector<8x256xf32>
    %118 = arith.select %116, %113, %117 : vector<8x256xi1>, vector<8x256xf32>
    %c16_42 = arith.constant 16 : index
    %c0_43 = arith.constant 0 : index
    %119 = vector.load %arg14[%c16_42, %c0_43] : memref<72x256xf32, #tpu.memory_space<vmem>>, vector<8x256xf32>
    tpu.vector_store %arg14[%c16_42, %c0_43], %118 {strides = array<i32>} : memref<72x256xf32, #tpu.memory_space<vmem>>, vector<8x256xf32>,
    %120 = vector.extract_strided_slice %92 {offsets = [0, 255], sizes = [8, 1], strides = [1, 1]} : vector<8x256xf32> to vector<8x1xf32>
    %121 = vector.extract_strided_slice %92 {offsets = [0, 0], sizes = [8, 255], strides = [1, 1]} : vector<8x256xf32> to vector<8x255xf32>
    %122 = tpu.concatenate %120, %121 in 1 : vector<8x1xf32>, vector<8x255xf32> -> vector<8x256xf32>
    %cst_44 = arith.constant 0.000000e+00 : f32
    %123 = vector.shape_cast %7 : vector<1x256xi1> to vector<1x256xi1>
    %124 = vector.broadcast %123 : vector<1x256xi1> to vector<8x256xi1>
    %125 = vector.broadcast %cst_44 : f32 to vector<8x256xf32>
    %126 = arith.select %124, %122, %125 : vector<8x256xi1>, vector<8x256xf32>
    %c24_45 = arith.constant 24 : index
    %c0_46 = arith.constant 0 : index
    %127 = vector.load %arg14[%c24_45, %c0_46] : memref<72x256xf32, #tpu.memory_space<vmem>>, vector<8x256xf32>
    tpu.vector_store %arg14[%c24_45, %c0_46], %126 {strides = array<i32>} : memref<72x256xf32, #tpu.memory_space<vmem>>, vector<8x256xf32>,
    %c32_47 = arith.constant 32 : index
    %c0_48 = arith.constant 0 : index
    %128 = vector.load %arg14[%c32_47, %c0_48] : memref<72x256xf32, #tpu.memory_space<vmem>>, vector<8x256xf32>
    tpu.vector_store %arg14[%c32_47, %c0_48], %92 {strides = array<i32>} : memref<72x256xf32, #tpu.memory_space<vmem>>, vector<8x256xf32>,
    %129 = vector.extract_strided_slice %92 {offsets = [0, 1], sizes = [8, 255], strides = [1, 1]} : vector<8x256xf32> to vector<8x255xf32>
    %130 = vector.extract_strided_slice %92 {offsets = [0, 0], sizes = [8, 1], strides = [1, 1]} : vector<8x256xf32> to vector<8x1xf32>
    %131 = tpu.concatenate %129, %130 in 1 : vector<8x255xf32>, vector<8x1xf32> -> vector<8x256xf32>
    %cst_49 = arith.constant 0.000000e+00 : f32
    %132 = vector.shape_cast %9 : vector<1x256xi1> to vector<1x256xi1>
    %133 = vector.broadcast %132 : vector<1x256xi1> to vector<8x256xi1>
    %134 = vector.broadcast %cst_49 : f32 to vector<8x256xf32>
    %135 = arith.select %133, %131, %134 : vector<8x256xi1>, vector<8x256xf32>
    %c40 = arith.constant 40 : index
    %c0_50 = arith.constant 0 : index
    %136 = vector.load %arg14[%c40, %c0_50] : memref<72x256xf32, #tpu.memory_space<vmem>>, vector<8x256xf32>
    tpu.vector_store %arg14[%c40, %c0_50], %135 {strides = array<i32>} : memref<72x256xf32, #tpu.memory_space<vmem>>, vector<8x256xf32>,
    %137 = vector.extract_strided_slice %92 {offsets = [0, 15], sizes = [8, 241], strides = [1, 1]} : vector<8x256xf32> to vector<8x241xf32>
    %138 = vector.extract_strided_slice %92 {offsets = [0, 0], sizes = [8, 15], strides = [1, 1]} : vector<8x256xf32> to vector<8x15xf32>
    %139 = tpu.concatenate %137, %138 in 1 : vector<8x241xf32>, vector<8x15xf32> -> vector<8x256xf32>
    %140 = arith.andi %5, %7 : vector<1x256xi1>
    %cst_51 = arith.constant 0.000000e+00 : f32
    %141 = vector.shape_cast %140 : vector<1x256xi1> to vector<1x256xi1>
    %142 = vector.broadcast %141 : vector<1x256xi1> to vector<8x256xi1>
    %143 = vector.broadcast %cst_51 : f32 to vector<8x256xf32>
    %144 = arith.select %142, %139, %143 : vector<8x256xi1>, vector<8x256xf32>
    %c48 = arith.constant 48 : index
    %c0_52 = arith.constant 0 : index
    %145 = vector.load %arg14[%c48, %c0_52] : memref<72x256xf32, #tpu.memory_space<vmem>>, vector<8x256xf32>
    tpu.vector_store %arg14[%c48, %c0_52], %144 {strides = array<i32>} : memref<72x256xf32, #tpu.memory_space<vmem>>, vector<8x256xf32>,
    %146 = vector.extract_strided_slice %92 {offsets = [0, 16], sizes = [8, 240], strides = [1, 1]} : vector<8x256xf32> to vector<8x240xf32>
    %147 = vector.extract_strided_slice %92 {offsets = [0, 0], sizes = [8, 16], strides = [1, 1]} : vector<8x256xf32> to vector<8x16xf32>
    %148 = tpu.concatenate %146, %147 in 1 : vector<8x240xf32>, vector<8x16xf32> -> vector<8x256xf32>
    %cst_53 = arith.constant 0.000000e+00 : f32
    %149 = vector.shape_cast %5 : vector<1x256xi1> to vector<1x256xi1>
    %150 = vector.broadcast %149 : vector<1x256xi1> to vector<8x256xi1>
    %151 = vector.broadcast %cst_53 : f32 to vector<8x256xf32>
    %152 = arith.select %150, %148, %151 : vector<8x256xi1>, vector<8x256xf32>
    %c56 = arith.constant 56 : index
    %c0_54 = arith.constant 0 : index
    %153 = vector.load %arg14[%c56, %c0_54] : memref<72x256xf32, #tpu.memory_space<vmem>>, vector<8x256xf32>
    tpu.vector_store %arg14[%c56, %c0_54], %152 {strides = array<i32>} : memref<72x256xf32, #tpu.memory_space<vmem>>, vector<8x256xf32>,
    %154 = vector.extract_strided_slice %92 {offsets = [0, 17], sizes = [8, 239], strides = [1, 1]} : vector<8x256xf32> to vector<8x239xf32>
    %155 = vector.extract_strided_slice %92 {offsets = [0, 0], sizes = [8, 17], strides = [1, 1]} : vector<8x256xf32> to vector<8x17xf32>
    %156 = tpu.concatenate %154, %155 in 1 : vector<8x239xf32>, vector<8x17xf32> -> vector<8x256xf32>
    %157 = arith.andi %5, %9 : vector<1x256xi1>
    %cst_55 = arith.constant 0.000000e+00 : f32
    %158 = vector.shape_cast %157 : vector<1x256xi1> to vector<1x256xi1>
    %159 = vector.broadcast %158 : vector<1x256xi1> to vector<8x256xi1>
    %160 = vector.broadcast %cst_55 : f32 to vector<8x256xf32>
    %161 = arith.select %159, %156, %160 : vector<8x256xi1>, vector<8x256xf32>
    %c64 = arith.constant 64 : index
    %c0_56 = arith.constant 0 : index
    %162 = vector.load %arg14[%c64, %c0_56] : memref<72x256xf32, #tpu.memory_space<vmem>>, vector<8x256xf32>
    tpu.vector_store %arg14[%c64, %c0_56], %161 {strides = array<i32>} : memref<72x256xf32, #tpu.memory_space<vmem>>, vector<8x256xf32>,
    %c0_57 = arith.constant 0 : index
    %c0_58 = arith.constant 0 : index
    %163 = vector.load %arg7[%c0_57, %c0_58] : memref<4x72xf32, #tpu.memory_space<vmem>>, vector<4x72xf32>
    %c0_59 = arith.constant 0 : index
    %c0_60 = arith.constant 0 : index
    %164 = vector.load %arg14[%c0_59, %c0_60] : memref<72x256xf32, #tpu.memory_space<vmem>>, vector<72x256xf32>
    %cst_61 = arith.constant dense<0.000000e+00> : vector<4x256xf32>
    %165 = tpu.matmul %163, %164, %cst_61 {dimension_numbers = #tpu.dot_dimension_numbers<[1], [0], [0], [1], [0, 0, 1, 1], [], []>} : vector<4x72xf32>, vector<72x256xf32>, vector<4x256xf32> -> vector<4x256xf32>
    %c0_62 = arith.constant 0 : index
    %c0_63 = arith.constant 0 : index
    %166 = vector.load %arg8[%c0_62, %c0_63] : memref<4x1xf32, #tpu.memory_space<vmem>>, vector<4x1xf32>
    %167 = vector.broadcast %166 : vector<4x1xf32> to vector<4x256xf32>
    %168 = arith.mulf %165, %167 : vector<4x256xf32>
    %c0_64 = arith.constant 0 : index
    %c0_65 = arith.constant 0 : index
    %169 = vector.load %arg9[%c0_64, %c0_65] : memref<4x1xf32, #tpu.memory_space<vmem>>, vector<4x1xf32>
    %170 = vector.broadcast %169 : vector<4x1xf32> to vector<4x256xf32>
    %171 = arith.addf %168, %170 : vector<4x256xf32>
    %cst_66 = arith.constant 0.000000e+00 : f32
    %172 = vector.broadcast %cst_66 : f32 to vector<4x256xf32>
    %173 = arith.maximumf %171, %172 : vector<4x256xf32>
    %174 = vector.extract_strided_slice %173 {offsets = [0, 239], sizes = [4, 17], strides = [1, 1]} : vector<4x256xf32> to vector<4x17xf32>
    %175 = vector.extract_strided_slice %173 {offsets = [0, 0], sizes = [4, 239], strides = [1, 1]} : vector<4x256xf32> to vector<4x239xf32>
    %176 = tpu.concatenate %174, %175 in 1 : vector<4x17xf32>, vector<4x239xf32> -> vector<4x256xf32>
    %177 = arith.andi %3, %7 : vector<1x256xi1>
    %cst_67 = arith.constant 0.000000e+00 : f32
    %178 = vector.shape_cast %177 : vector<1x256xi1> to vector<1x256xi1>
    %179 = vector.broadcast %178 : vector<1x256xi1> to vector<4x256xi1>
    %180 = vector.broadcast %cst_67 : f32 to vector<4x256xf32>
    %181 = arith.select %179, %176, %180 : vector<4x256xi1>, vector<4x256xf32>
    %c0_68 = arith.constant 0 : index
    %c0_69 = arith.constant 0 : index
    %182 = vector.load %arg14[%c0_68, %c0_69] : memref<72x256xf32, #tpu.memory_space<vmem>>, vector<4x256xf32>
    tpu.vector_store %arg14[%c0_68, %c0_69], %181 {strides = array<i32>} : memref<72x256xf32, #tpu.memory_space<vmem>>, vector<4x256xf32>,
    %183 = vector.extract_strided_slice %173 {offsets = [0, 240], sizes = [4, 16], strides = [1, 1]} : vector<4x256xf32> to vector<4x16xf32>
    %184 = vector.extract_strided_slice %173 {offsets = [0, 0], sizes = [4, 240], strides = [1, 1]} : vector<4x256xf32> to vector<4x240xf32>
    %185 = tpu.concatenate %183, %184 in 1 : vector<4x16xf32>, vector<4x240xf32> -> vector<4x256xf32>
    %cst_70 = arith.constant 0.000000e+00 : f32
    %186 = vector.shape_cast %3 : vector<1x256xi1> to vector<1x256xi1>
    %187 = vector.broadcast %186 : vector<1x256xi1> to vector<4x256xi1>
    %188 = vector.broadcast %cst_70 : f32 to vector<4x256xf32>
    %189 = arith.select %187, %185, %188 : vector<4x256xi1>, vector<4x256xf32>
    %c4_71 = arith.constant 4 : index
    %c0_72 = arith.constant 0 : index
    %190 = vector.load %arg14[%c4_71, %c0_72] : memref<72x256xf32, #tpu.memory_space<vmem>>, vector<4x256xf32>
    tpu.vector_store %arg14[%c4_71, %c0_72], %189 {strides = array<i32>} : memref<72x256xf32, #tpu.memory_space<vmem>>, vector<4x256xf32>,
    %191 = vector.extract_strided_slice %173 {offsets = [0, 241], sizes = [4, 15], strides = [1, 1]} : vector<4x256xf32> to vector<4x15xf32>
    %192 = vector.extract_strided_slice %173 {offsets = [0, 0], sizes = [4, 241], strides = [1, 1]} : vector<4x256xf32> to vector<4x241xf32>
    %193 = tpu.concatenate %191, %192 in 1 : vector<4x15xf32>, vector<4x241xf32> -> vector<4x256xf32>
    %194 = arith.andi %3, %9 : vector<1x256xi1>
    %cst_73 = arith.constant 0.000000e+00 : f32
    %195 = vector.shape_cast %194 : vector<1x256xi1> to vector<1x256xi1>
    %196 = vector.broadcast %195 : vector<1x256xi1> to vector<4x256xi1>
    %197 = vector.broadcast %cst_73 : f32 to vector<4x256xf32>
    %198 = arith.select %196, %193, %197 : vector<4x256xi1>, vector<4x256xf32>
    %c8_74 = arith.constant 8 : index
    %c0_75 = arith.constant 0 : index
    %199 = vector.load %arg14[%c8_74, %c0_75] : memref<72x256xf32, #tpu.memory_space<vmem>>, vector<4x256xf32>
    tpu.vector_store %arg14[%c8_74, %c0_75], %198 {strides = array<i32>} : memref<72x256xf32, #tpu.memory_space<vmem>>, vector<4x256xf32>,
    %200 = vector.extract_strided_slice %173 {offsets = [0, 255], sizes = [4, 1], strides = [1, 1]} : vector<4x256xf32> to vector<4x1xf32>
    %201 = vector.extract_strided_slice %173 {offsets = [0, 0], sizes = [4, 255], strides = [1, 1]} : vector<4x256xf32> to vector<4x255xf32>
    %202 = tpu.concatenate %200, %201 in 1 : vector<4x1xf32>, vector<4x255xf32> -> vector<4x256xf32>
    %cst_76 = arith.constant 0.000000e+00 : f32
    %203 = vector.shape_cast %7 : vector<1x256xi1> to vector<1x256xi1>
    %204 = vector.broadcast %203 : vector<1x256xi1> to vector<4x256xi1>
    %205 = vector.broadcast %cst_76 : f32 to vector<4x256xf32>
    %206 = arith.select %204, %202, %205 : vector<4x256xi1>, vector<4x256xf32>
    %c12_77 = arith.constant 12 : index
    %c0_78 = arith.constant 0 : index
    %207 = vector.load %arg14[%c12_77, %c0_78] : memref<72x256xf32, #tpu.memory_space<vmem>>, vector<4x256xf32>
    tpu.vector_store %arg14[%c12_77, %c0_78], %206 {strides = array<i32>} : memref<72x256xf32, #tpu.memory_space<vmem>>, vector<4x256xf32>,
    %c16_79 = arith.constant 16 : index
    %c0_80 = arith.constant 0 : index
    %208 = vector.load %arg14[%c16_79, %c0_80] : memref<72x256xf32, #tpu.memory_space<vmem>>, vector<4x256xf32>
    tpu.vector_store %arg14[%c16_79, %c0_80], %173 {strides = array<i32>} : memref<72x256xf32, #tpu.memory_space<vmem>>, vector<4x256xf32>,
    %209 = vector.extract_strided_slice %173 {offsets = [0, 1], sizes = [4, 255], strides = [1, 1]} : vector<4x256xf32> to vector<4x255xf32>
    %210 = vector.extract_strided_slice %173 {offsets = [0, 0], sizes = [4, 1], strides = [1, 1]} : vector<4x256xf32> to vector<4x1xf32>
    %211 = tpu.concatenate %209, %210 in 1 : vector<4x255xf32>, vector<4x1xf32> -> vector<4x256xf32>
    %cst_81 = arith.constant 0.000000e+00 : f32
    %212 = vector.shape_cast %9 : vector<1x256xi1> to vector<1x256xi1>
    %213 = vector.broadcast %212 : vector<1x256xi1> to vector<4x256xi1>
    %214 = vector.broadcast %cst_81 : f32 to vector<4x256xf32>
    %215 = arith.select %213, %211, %214 : vector<4x256xi1>, vector<4x256xf32>
    %c20_82 = arith.constant 20 : index
    %c0_83 = arith.constant 0 : index
    %216 = vector.load %arg14[%c20_82, %c0_83] : memref<72x256xf32, #tpu.memory_space<vmem>>, vector<4x256xf32>
    tpu.vector_store %arg14[%c20_82, %c0_83], %215 {strides = array<i32>} : memref<72x256xf32, #tpu.memory_space<vmem>>, vector<4x256xf32>,
    %217 = vector.extract_strided_slice %173 {offsets = [0, 15], sizes = [4, 241], strides = [1, 1]} : vector<4x256xf32> to vector<4x241xf32>
    %218 = vector.extract_strided_slice %173 {offsets = [0, 0], sizes = [4, 15], strides = [1, 1]} : vector<4x256xf32> to vector<4x15xf32>
    %219 = tpu.concatenate %217, %218 in 1 : vector<4x241xf32>, vector<4x15xf32> -> vector<4x256xf32>
    %220 = arith.andi %5, %7 : vector<1x256xi1>
    %cst_84 = arith.constant 0.000000e+00 : f32
    %221 = vector.shape_cast %220 : vector<1x256xi1> to vector<1x256xi1>
    %222 = vector.broadcast %221 : vector<1x256xi1> to vector<4x256xi1>
    %223 = vector.broadcast %cst_84 : f32 to vector<4x256xf32>
    %224 = arith.select %222, %219, %223 : vector<4x256xi1>, vector<4x256xf32>
    %c24_85 = arith.constant 24 : index
    %c0_86 = arith.constant 0 : index
    %225 = vector.load %arg14[%c24_85, %c0_86] : memref<72x256xf32, #tpu.memory_space<vmem>>, vector<4x256xf32>
    tpu.vector_store %arg14[%c24_85, %c0_86], %224 {strides = array<i32>} : memref<72x256xf32, #tpu.memory_space<vmem>>, vector<4x256xf32>,
    %226 = vector.extract_strided_slice %173 {offsets = [0, 16], sizes = [4, 240], strides = [1, 1]} : vector<4x256xf32> to vector<4x240xf32>
    %227 = vector.extract_strided_slice %173 {offsets = [0, 0], sizes = [4, 16], strides = [1, 1]} : vector<4x256xf32> to vector<4x16xf32>
    %228 = tpu.concatenate %226, %227 in 1 : vector<4x240xf32>, vector<4x16xf32> -> vector<4x256xf32>
    %cst_87 = arith.constant 0.000000e+00 : f32
    %229 = vector.shape_cast %5 : vector<1x256xi1> to vector<1x256xi1>
    %230 = vector.broadcast %229 : vector<1x256xi1> to vector<4x256xi1>
    %231 = vector.broadcast %cst_87 : f32 to vector<4x256xf32>
    %232 = arith.select %230, %228, %231 : vector<4x256xi1>, vector<4x256xf32>
    %c28_88 = arith.constant 28 : index
    %c0_89 = arith.constant 0 : index
    %233 = vector.load %arg14[%c28_88, %c0_89] : memref<72x256xf32, #tpu.memory_space<vmem>>, vector<4x256xf32>
    tpu.vector_store %arg14[%c28_88, %c0_89], %232 {strides = array<i32>} : memref<72x256xf32, #tpu.memory_space<vmem>>, vector<4x256xf32>,
    %234 = vector.extract_strided_slice %173 {offsets = [0, 17], sizes = [4, 239], strides = [1, 1]} : vector<4x256xf32> to vector<4x239xf32>
    %235 = vector.extract_strided_slice %173 {offsets = [0, 0], sizes = [4, 17], strides = [1, 1]} : vector<4x256xf32> to vector<4x17xf32>
    %236 = tpu.concatenate %234, %235 in 1 : vector<4x239xf32>, vector<4x17xf32> -> vector<4x256xf32>
    %237 = arith.andi %5, %9 : vector<1x256xi1>
    %cst_90 = arith.constant 0.000000e+00 : f32
    %238 = vector.shape_cast %237 : vector<1x256xi1> to vector<1x256xi1>
    %239 = vector.broadcast %238 : vector<1x256xi1> to vector<4x256xi1>
    %240 = vector.broadcast %cst_90 : f32 to vector<4x256xf32>
    %241 = arith.select %239, %236, %240 : vector<4x256xi1>, vector<4x256xf32>
    %c32_91 = arith.constant 32 : index
    %c0_92 = arith.constant 0 : index
    %242 = vector.load %arg14[%c32_91, %c0_92] : memref<72x256xf32, #tpu.memory_space<vmem>>, vector<4x256xf32>
    tpu.vector_store %arg14[%c32_91, %c0_92], %241 {strides = array<i32>} : memref<72x256xf32, #tpu.memory_space<vmem>>, vector<4x256xf32>,
    %c0_93 = arith.constant 0 : index
    %c0_94 = arith.constant 0 : index
    %243 = vector.load %arg10[%c0_93, %c0_94] : memref<4x36xf32, #tpu.memory_space<vmem>>, vector<4x36xf32>
    %c0_95 = arith.constant 0 : index
    %c0_96 = arith.constant 0 : index
    %244 = vector.load %arg14[%c0_95, %c0_96] : memref<72x256xf32, #tpu.memory_space<vmem>>, vector<36x256xf32>
    %cst_97 = arith.constant dense<0.000000e+00> : vector<4x256xf32>
    %245 = tpu.matmul %243, %244, %cst_97 {dimension_numbers = #tpu.dot_dimension_numbers<[1], [0], [0], [1], [0, 0, 1, 1], [], []>} : vector<4x36xf32>, vector<36x256xf32>, vector<4x256xf32> -> vector<4x256xf32>
    %c0_98 = arith.constant 0 : index
    %c0_99 = arith.constant 0 : index
    %246 = vector.load %arg11[%c0_98, %c0_99] : memref<4x1xf32, #tpu.memory_space<vmem>>, vector<4x1xf32>
    %247 = vector.broadcast %246 : vector<4x1xf32> to vector<4x256xf32>
    %248 = arith.mulf %245, %247 : vector<4x256xf32>
    %c0_100 = arith.constant 0 : index
    %c0_101 = arith.constant 0 : index
    %249 = vector.load %arg12[%c0_100, %c0_101] : memref<4x1xf32, #tpu.memory_space<vmem>>, vector<4x1xf32>
    %250 = vector.broadcast %249 : vector<4x1xf32> to vector<4x256xf32>
    %251 = arith.addf %248, %250 : vector<4x256xf32>
    %252 = vector.extract_strided_slice %93 {offsets = [0, 0], sizes = [8, 256], strides = [1, 1]} : vector<16x256xf32> to vector<8x256xf32>
    %253 = arith.addf %92, %252 : vector<8x256xf32>
    %c0_102 = arith.constant 0 : index
    %c0_103 = arith.constant 0 : index
    %c0_104 = arith.constant 0 : index
    %254 = vector.load %arg13[%c0_102, %c0_103, %c0_104] : memref<1x16x256xf32, #tpu.memory_space<vmem>>, vector<1x8x256xf32>
    %255 = vector.shape_cast %254 : vector<1x8x256xf32> to vector<8x256xf32>
    %256 = vector.shape_cast %253 : vector<8x256xf32> to vector<1x8x256xf32>
    tpu.vector_store %arg13[%c0_102, %c0_103, %c0_104], %256 {strides = array<i32>} : memref<1x16x256xf32, #tpu.memory_space<vmem>>, vector<1x8x256xf32>,
    %257 = vector.extract_strided_slice %93 {offsets = [8, 0], sizes = [4, 256], strides = [1, 1]} : vector<16x256xf32> to vector<4x256xf32>
    %258 = arith.addf %173, %257 : vector<4x256xf32>
    %c0_105 = arith.constant 0 : index
    %c8_106 = arith.constant 8 : index
    %c0_107 = arith.constant 0 : index
    %259 = vector.load %arg13[%c0_105, %c8_106, %c0_107] : memref<1x16x256xf32, #tpu.memory_space<vmem>>, vector<1x4x256xf32>
    %260 = vector.shape_cast %259 : vector<1x4x256xf32> to vector<4x256xf32>
    %261 = vector.shape_cast %258 : vector<4x256xf32> to vector<1x4x256xf32>
    tpu.vector_store %arg13[%c0_105, %c8_106, %c0_107], %261 {strides = array<i32>} : memref<1x16x256xf32, #tpu.memory_space<vmem>>, vector<1x4x256xf32>,
    %262 = vector.extract_strided_slice %93 {offsets = [12, 0], sizes = [4, 256], strides = [1, 1]} : vector<16x256xf32> to vector<4x256xf32>
    %263 = arith.addf %251, %262 : vector<4x256xf32>
    %c0_108 = arith.constant 0 : index
    %c12_109 = arith.constant 12 : index
    %c0_110 = arith.constant 0 : index
    %264 = vector.load %arg13[%c0_108, %c12_109, %c0_110] : memref<1x16x256xf32, #tpu.memory_space<vmem>>, vector<1x4x256xf32>
    %265 = vector.shape_cast %264 : vector<1x4x256xf32> to vector<4x256xf32>
    %266 = vector.shape_cast %263 : vector<4x256xf32> to vector<1x4x256xf32>
    tpu.vector_store %arg13[%c0_108, %c12_109, %c0_110], %266 {strides = array<i32>} : memref<1x16x256xf32, #tpu.memory_space<vmem>>, vector<1x4x256xf32>,
    return
  }
  func.func @transform_0(%arg0: i32) -> (i32, i32) {
    %c0_i32 = arith.constant 0 : i32
    %c0_i32_0 = arith.constant 0 : i32
    %c0_i32_1 = arith.constant 0 : i32
    return %c0_i32, %c0_i32_0 : i32, i32
  }
  func.func @transform_1(%arg0: i32) -> (i32, i32) {
    %c0_i32 = arith.constant 0 : i32
    %c0_i32_0 = arith.constant 0 : i32
    %c0_i32_1 = arith.constant 0 : i32
    return %c0_i32, %c0_i32_0 : i32, i32
  }
  func.func @transform_2(%arg0: i32) -> (i32, i32, i32) {
    %c0_i32 = arith.constant 0 : i32
    %c0_i32_0 = arith.constant 0 : i32
    %c0_i32_1 = arith.constant 0 : i32
    return %arg0, %c0_i32, %c0_i32_0 : i32, i32, i32
  }
  func.func @transform_3(%arg0: i32) -> (i32, i32) {
    %c0_i32 = arith.constant 0 : i32
    %c0_i32_0 = arith.constant 0 : i32
    %c0_i32_1 = arith.constant 0 : i32
    return %c0_i32, %c0_i32_0 : i32, i32
  }
  func.func @transform_4(%arg0: i32) -> (i32, i32) {
    %c0_i32 = arith.constant 0 : i32
    %c0_i32_0 = arith.constant 0 : i32
    %c0_i32_1 = arith.constant 0 : i32
    return %c0_i32, %c0_i32_0 : i32, i32
  }
  func.func @transform_5(%arg0: i32) -> (i32, i32) {
    %c0_i32 = arith.constant 0 : i32
    %c0_i32_0 = arith.constant 0 : i32
    %c0_i32_1 = arith.constant 0 : i32
    return %c0_i32, %c0_i32_0 : i32, i32
  }
  func.func @transform_6(%arg0: i32) -> (i32, i32) {
    %c0_i32 = arith.constant 0 : i32
    %c0_i32_0 = arith.constant 0 : i32
    %c0_i32_1 = arith.constant 0 : i32
    return %c0_i32, %c0_i32_0 : i32, i32
  }
  func.func @transform_7(%arg0: i32) -> (i32, i32) {
    %c0_i32 = arith.constant 0 : i32
    %c0_i32_0 = arith.constant 0 : i32
    %c0_i32_1 = arith.constant 0 : i32
    return %c0_i32, %c0_i32_0 : i32, i32
  }
  func.func @transform_8(%arg0: i32) -> (i32, i32) {
    %c0_i32 = arith.constant 0 : i32
    %c0_i32_0 = arith.constant 0 : i32
    %c0_i32_1 = arith.constant 0 : i32
    return %c0_i32, %c0_i32_0 : i32, i32
  }
  func.func @transform_9(%arg0: i32) -> (i32, i32) {
    %c0_i32 = arith.constant 0 : i32
    %c0_i32_0 = arith.constant 0 : i32
    %c0_i32_1 = arith.constant 0 : i32
    return %c0_i32, %c0_i32_0 : i32, i32
  }
  func.func @transform_10(%arg0: i32) -> (i32, i32) {
    %c0_i32 = arith.constant 0 : i32
    %c0_i32_0 = arith.constant 0 : i32
    %c0_i32_1 = arith.constant 0 : i32
    return %c0_i32, %c0_i32_0 : i32, i32
  }
  func.func @transform_11(%arg0: i32) -> (i32, i32) {
    %c0_i32 = arith.constant 0 : i32
    %c0_i32_0 = arith.constant 0 : i32
    %c0_i32_1 = arith.constant 0 : i32
    return %c0_i32, %c0_i32_0 : i32, i32
  }
  func.func @transform_12(%arg0: i32) -> (i32, i32, i32) {
    %c0_i32 = arith.constant 0 : i32
    %c0_i32_0 = arith.constant 0 : i32
    %c0_i32_1 = arith.constant 0 : i32
    return %arg0, %c0_i32, %c0_i32_0 : i32, i32, i32
  }
}

</mosaic_0001>

<bundles_post_ra>
// kernel: tpu_custom_call.1
= control target key start
LH: loop header
LB: loop body
LE: loop exit
PB: predicated region body
PF: predicated region fallthrough
CT: control target
= control target key end

     0   :  { %s2169_s0 = inlined_call_operand.vmem [shape: s32[1,256], index: 0, kind: input, shape index: {}]   ;;  %s2170_s1 = inlined_call_operand.vmem [shape: s32[1,256], index: 1, kind: input, shape index: {}]   ;;  %s2171_s2 = inlined_call_operand.vmem [shape: f32[2,4,256], index: 2, kind: input, shape index: {}]   ;;  %s2172_s3 = inlined_call_operand.vmem [shape: f32[24,36], index: 3, kind: input, shape index: {}]   ;;  %s2173_s4 = inlined_call_operand.vmem [shape: f32[24,1], index: 4, kind: input, shape index: {}]   ;;  %s2174_s5 = inlined_call_operand.vmem [shape: f32[24,1], index: 5, kind: input, shape index: {}]   ;;  %s2175_s6 = inlined_call_operand.vmem [shape: f32[4,72], index: 6, kind: input, shape index: {}]   ;;  %s2176_s7 = inlined_call_operand.vmem [shape: f32[4,1], index: 7, kind: input, shape index: {}]   ;;  %s2177_s8 = inlined_call_operand.vmem [shape: f32[4,1], index: 8, kind: input, shape index: {}]   ;;  %s2178_s9 = inlined_call_operand.vmem [shape: f32[4,36], index: 9, kind: input, shape index: {}]   ;;  %s2179_s10 = inlined_call_operand.vmem [shape: f32[4,1], index: 10, kind: input, shape index: {}]   ;;  %s2180_s11 = inlined_call_operand.vmem [shape: f32[4,1], index: 11, kind: input, shape index: {}]   ;;  %s2181_s12 = inlined_call_operand.hbm [shape: f32[2,16,256], index: 12, kind: output, shape index: {}]  }
   0x1   :  { %2223 = sst [smem:[#allocation8_spill]] %s2169_s0 }
   0x2   :  { %2224 = sst [smem:[#allocation9_spill]] %s2170_s1 }
   0x3   :  { %2225 = sst [smem:[#allocation10_spill]] %s2171_s2 }
   0x4   :  { %17 = vsyncpa [#allocation4], 0 }
   0x5   :  { %19 = vsyncpa [#allocation4 + $0x1], 0  ;;  %s1605_s21 = smov 0   ;;  %s1607_s22 = smov 0  }
   0x6   :  { %s1609_s23 = smov 0   ;;  %s1611_s24 = smov 0  }
   0x7 LB: > { %2226 = sst [smem:[#allocation6_spill]] %s1522_s23  ;;  %s1626_s25 = sadd.s32 4294967295, %s1526_s24   ;;  %s1526_s24 = sphi %s1611_s24, %s2324_s24   ;;  %s1522_s23 = sphi %s1609_s23, %s2321_s23   ;;  %s1518_s22 = sphi %s1607_s22, %s2323_s22   ;;  %s1514_s21 = sphi %s1605_s21, %s2322_s21  }
   0x8   : > { %s1374_s26 = sadd.s32 4294967294, %s1526_s24   ;;  %s1630_s27 = sadd.s32 1, %s1526_s24  }
   0x9   : > { %s289_s28 = sadd.s32 1, %s1522_s23  ;;  %s286_s29 = ssub.s32 %s1526_s24, %s1630_s27 }
   0xa   : > { %p299_p0 = scmp.ne.s32.totalorder %s1522_s23, %s1518_s22  ;;  %p287_p1 = scmp.eq.s32.totalorder %s286_s29, 0 }
   0xb   : > { %p300_p2 = scmp.eq.s32.totalorder %s1626_s25, 1  ;;  %p305_p3 = scmp.ne.s32.totalorder %s1518_s22, %s1514_s21 }
   0xc   : > { %p306_p4 = scmp.eq.s32.totalorder %s1374_s26, 1  ;;  %p1377_p7 = scmp.ge.s32.totalorder %s1526_s24, 1 }
   0xd   : > { %s1641_s30 = scalar_select %p287_p1, %s1522_s23, %s289_s28  }
   0xe   : > { %p1643_p5 = por %p300_p2, %p299_p0  ;;  %p1647_p6 = por %p306_p4, %p305_p3 }
   0xf   : > { %2227 = sst [smem:[#allocation7_spill]] %s1641_s30  ;;  %p365_p8 = scmp.lt.s32.totalorder %s1526_s24, 3 }
  0x11   : > { %p366_p9 = pnand %p1377_p7, %p365_p8 }
  0x12   : > { %p407_p10 = scmp.lt.s32.totalorder (!%p366_p9), %s1626_s25, 1  ;;  %s2230_s2 = sld [smem:[#allocation10_spill]] (!%p366_p9) }
  0x13   : > { %369 = sbr.rel (%p366_p9) target bundleno = 1102 (0x44e), region = 68  ;;  %s2192_s20 = smov (!%p366_p9), 111  }
  0x14   : > { %s2190_s26 = smov (!%p366_p9), 112   ;;  %s2182_s28 = smov (!%p366_p9), 127  }
  0x15   : > { %s2186_s29 = smov (!%p366_p9), 113   ;;  %s2188_s17 = smov (!%p366_p9), 15  }
  0x16   : > { %s2208_s18 = smov (!%p366_p9), 17   ;;  %s2231_s0 = sld [smem:[#allocation8_spill]] (!%p366_p9) }
  0x17   : > { %s2232_s1 = sld [smem:[#allocation9_spill]] (!%p366_p9)  ;;  %s404_s30 = sand.u32 (!%p366_p9), 1, %s1518_s22  }
  0x18   : > { %s408_s15 = scalar_select %p407_p10, %s1626_s25, 1  ;;  %v1528_v0 = vmov 0   ;;  %v1536_v3 = vmov 0.0   ;;  %v765_v4 = vld [vmem:[%s2173_s4] sm:$0xff]  ;;  %v433_v8 = vlaneseq  ;;  %vm2198_vm5 = vcmask 908288  }
  0x19   : > { %1447 = vset.pattern.permute.xlu0 %v1528_v0  ;;  %1448 = vset.pattern.permute.xlu1 %v1528_v0  ;;  %v789_v5 = vld [vmem:[%s2174_s5] sm:$0xff]  ;;  %v2233_v22 = vmov 0  ;;  %v2235_v23 = vmov 0  ;;  %vm2196_vm8 = vcmask 1039360   ;;  %vm2197_vm9 = vcmask 916480  }
  0x1a   : > { %s1395_s16 = sshll.u32 %s408_s15, 3  ;;  %s2194_s15 = smov 1   ;;  %746 = vmatprep.mubr.f32.mxu0 %v1536_v3  ;;  %1010 = vmatprep.mubr.f32.mxu1 %v1536_v3  ;;  %v434_v9 = vshrl.u32 %v433_v8, 7  ;;  %v2237_v35 = vmov 0  ;;  %vm2199_vm11 = vcmask 924672  }
  0x1b   : > { %s411_s19 = scalar_lea.vmem %s2230_s2, %s1395_s16  ;;  %s2184_s16 = smov 16  }
  0x1c   : > { %v418_v1 = vld [vmem:[%s411_s19] sm:$0xff]  ;;  %v1698_v10 = vsub.s32 0, %v434_v9  ;;  %v1700_v11 = vsub.s32 1, %v434_v9  ;;  %s2272_s19 = smov 15  }
  0x1d   : > { %626 = vrot.lane.b32.xlu1 %v418_v1, %s2192_s20  ;;  %536 = vst [vmem:[#allocation2 + $0x20] sm:$0xf] %v418_v1  ;;  %595 = vrot.lane.b32.xlu0 %v418_v1, %s2190_s26  ;;  %v420_v2 = vcombine.high %v418_v1, %v418_v1  ;;  %v1687_v6 = vld [vmem:[%s2231_s0] sm:$0x3]  ;;  %s2274_s0 = smov 17  }
  0x1e   : > { %v1692_v7 = vld [vmem:[%s2232_s1] sm:$0x3]  ;;  %vm415_vm0 = vcmp.le.s32.totalorder %v1687_v6, 14  ;;  %vm414_vm15 = vcmp.ge.s32.totalorder %v1687_v6, 1 }
  0x1f   : > { %537 = vst [vmem:[#allocation2 + $0x8] sm:$0xf] %v420_v2  ;;  %vm417_vm1 = vcmp.le.s32.totalorder %v1692_v7, 14  ;;  %vm416_vm3 = vcmp.ge.s32.totalorder %v1692_v7, 1  ;;  %v605_v18 = vsel %vm415_vm0, 1, %v1528_v0  ;;  %v457_v59 = vsel %vm414_vm15, 1, %v1528_v0 }
  0x20   : > { %vm636_vm2 = vmand %vm415_vm0, %vm417_vm1  ;;  %v548_v15 = vsel %vm417_vm1, 1, %v1528_v0  ;;  %v609_v24 = vrot.slane %v605_v18, %v1698_v10  ;;  %v613_v25 = vrot.slane %v605_v18, %v1700_v11  ;;  %v514_v32 = vsel %vm416_vm3, 1, %v1528_v0 }
  0x21   : > { %538 = vrot.lane.b32.xlu0 %v418_v1, %s2182_s28  ;;  %628 = vrot.lane.b32.xlu1 %v420_v2, %s2192_s20  ;;  %v637_v12 = vsel %vm636_vm2, 1, %v1528_v0  ;;  %vm579_vm4 = vmand %vm415_vm0, %vm416_vm3  ;;  %v552_v20 = vrot.slane %v548_v15, %v1698_v10  ;;  %v556_v21 = vrot.slane %v548_v15, %v1700_v11  ;;  %v518_v43 = vrot.slane %v514_v32, %v1698_v10  ;;  %s2273_s20 = smov 16  }
  0x22   : > { %v641_v13 = vrot.slane %v637_v12, %v1698_v10  ;;  %v645_v14 = vrot.slane %v637_v12, %v1700_v11  ;;  %v580_v19 = vsel %vm579_vm4, 1, %v1528_v0  ;;  %vm1744_vm13 = vcmp.eq.s32.totalorder %v609_v24, 1 }
  0x23   : > { %v584_v28 = vrot.slane %v580_v19, %v1698_v10  ;;  %v588_v29 = vrot.slane %v580_v19, %v1700_v11  ;;  %vm1736_vm10 = vcmp.eq.s32.totalorder %v552_v20, 1  ;;  %vm1740_vm12 = vcmp.eq.s32.totalorder %v556_v21, 1 }
  0x24   : > { %vm1715_vm6 = vcmp.eq.s32.totalorder %v641_v13, 1  ;;  %vm1719_vm7 = vcmp.eq.s32.totalorder %v645_v14, 1  ;;  %v2238_v35 = vsel %vm1736_vm10, 4294967295, %v2237_v35  ;;  %vm1748_vm14 = vcmp.eq.s32.totalorder %v613_v25, 1 }
  0x25   : > { %540 = vrot.lane.b32.xlu1 %v420_v2, %s2182_s28  ;;  %597 = vrot.lane.b32.xlu0 %v420_v2, %s2190_s26  ;;  %v2234_v22 = vsel %vm1715_vm6, 4294967295, %v2233_v22  ;;  %v2236_v23 = vsel %vm1719_vm7, 4294967295, %v2235_v23  ;;  %vm1753_vm0 = vcmp.eq.s32.totalorder %v584_v28, 1  ;;  %vm1757_vm2 = vcmp.eq.s32.totalorder %v588_v29, 1  ;;  %s2267_s28 = smov 1   ;;  %s1538_s26 = smov [#allocation3]  }
  0x26   : > { %v522_v44 = vrot.slane %v514_v32, %v1700_v11  ;;  %vm2202_vm4 = vcmask 1043456   ;;  %v461_v9 = vrot.slane %v457_v59, %v1698_v10  ;;  %v465_v12 = vrot.slane %v457_v59, %v1700_v11  ;;  %s1470_s1 = sshll.u32 %s1538_s26, 4  ;;  %s1471_s1 = int_to_ptr.vmem [resolvable:$false] %s1470_s1 }
  0x27   : > { %v2257_v7 = vmov 0  ;;  %s1472_s2 = scalar_lea.vmem %s1471_s1, 1024 }
  0x29   : > { %571 = vrot.lane.b32.xlu1 %v420_v2, %s2186_s29  ;;  %569 = vrot.lane.b32.xlu0 %v418_v1, %s2186_s29  ;;  %s2268_s29 = smov 111  }
  0x2d   : > { %507 = vrot.lane.b32.xlu1 %v418_v1, %s2194_s15  ;;  %504 = vrot.lane.b32.xlu0 %v420_v2, %s2194_s15  ;;  %s2269_s15 = smov 112  }
  0x31   : > { %450 = vrot.lane.b32.xlu1 %v418_v1, %s2184_s16  ;;  %447 = vrot.lane.b32.xlu0 %v420_v2, %s2184_s16  ;;  %s2270_s16 = smov 113  }
  0x35   : > { %481 = vrot.lane.b32.xlu1 %v418_v1, %s2188_s17  ;;  %478 = vrot.lane.b32.xlu0 %v420_v2, %s2188_s17  ;;  %s2271_s17 = smov 127  }
  0x39   : > { %424 = vrot.lane.b32.xlu1 %v418_v1, %s2208_s18  ;;  %421 = vrot.lane.b32.xlu0 %v420_v2, %s2208_s18  ;;  %s2128_s18 = scalar_lea.sflag [#allocation4], %s404_s30 }
  0x3d   : > { %770 = vperm.xlu0 %1447, %v765_v4   ;;  %794 = vperm.xlu1 %1448, %v789_v5  }
  0x8f   : > { %v627_v16 = vpop.permute.xlu1 %626  ;;  %v596_v17 = vpop.permute.xlu0 %595 }
  0x93   : > { %v539_v26 = vpop.permute.xlu0 %538  ;;  %v629_v27 = vpop.permute.xlu1 %628 }
  0x94   : > { %v631_v30 = vsel %vm2198_vm5, %v627_v16, %v629_v27  ;;  %v635_v31 = vsel %vm2198_vm5, %v629_v27, %v627_v16  ;;  %vm1788_vm5 = vcmp.eq.s32.totalorder %v518_v43, 1 }
  0x95   : > { %v648_v33 = vsel %vm1715_vm6, %v631_v30, 0.0  ;;  %v649_v34 = vsel %vm1719_vm7, %v635_v31, 0.0 }
  0x96   : > { %650 = vst [vmem:[#allocation2 + $0x88] sm:$0xf] %v648_v33  ;;  %651 = vst [vmem:[#allocation2 + $0x40] sm:$0xf] %v649_v34 }
  0x97   : > { %v541_v39 = vpop.permute.xlu1 %540  ;;  %v598_v40 = vpop.permute.xlu0 %597 }
  0x98   : > { %v543_v45 = vsel %vm2196_vm8, %v539_v26, %v541_v39  ;;  %v547_v46 = vsel %vm2196_vm8, %v541_v39, %v539_v26  ;;  %v600_v47 = vsel %vm2197_vm9, %v596_v17, %v598_v40  ;;  %v604_v48 = vsel %vm2197_vm9, %v598_v40, %v596_v17  ;;  %vm1782_vm8 = vmand %vm414_vm15, %vm417_vm1 }
  0x99   : > { %v559_v49 = vsel %vm1736_vm10, %v543_v45, 0.0  ;;  %v560_v50 = vsel %vm1740_vm12, %v547_v46, 0.0  ;;  %v616_v51 = vsel %vm1744_vm13, %v600_v47, 0.0  ;;  %v617_v52 = vsel %vm1748_vm14, %v604_v48, 0.0  ;;  %vm431_vm10 = vmand %vm414_vm15, %vm416_vm3 }
  0x9a   : > { %v563_v53 = vrot.slane %v559_v49, 4  ;;  %v564_v54 = vrot.slane %v560_v50, 4  ;;  %v620_v55 = vrot.slane %v616_v51, 4  ;;  %v621_v56 = vrot.slane %v617_v52, 4 }
  0x9b   : > { %v572_v57 = vpop.permute.xlu1 %571  ;;  %v570_v58 = vpop.permute.xlu0 %569  ;;  %vm2204_vm9 = vcmask 7168   ;;  %vm1797_vm1 = vcmp.eq.s32.totalorder %v522_v44, 1  ;;  %v489_v13 = vsel %vm1782_vm8, 1, %v1528_v0  ;;  %vm1819_vm8 = vcmp.eq.s32.totalorder %v461_v9, 1 }
  0x9c   : > { %567 = vst [vmem:[#allocation2 + $0x20] sm:$0xf0] %v563_v53  ;;  %568 = vst [vmem:[#allocation2 + $0x8] sm:$0xf0] %v564_v54  ;;  %v574_v61 = vsel %vm2199_vm11, %v570_v58, %v572_v57  ;;  %v578_v62 = vsel %vm2199_vm11, %v572_v57, %v570_v58  ;;  %vm2203_vm11 = vcmask 130048   ;;  %v493_v20 = vrot.slane %v489_v13, %v1698_v10 }
  0x9d   : > { %624 = vst [vmem:[#allocation2 + $0x70] sm:$0xf0] %v620_v55  ;;  %625 = vst [vmem:[#allocation2 + $0x80] sm:$0xf0] %v621_v56  ;;  %v591_v1 = vsel %vm1753_vm0, %v574_v61, 0.0  ;;  %v592_v2 = vsel %vm1757_vm2, %v578_v62, 0.0  ;;  %v497_v21 = vrot.slane %v489_v13, %v1700_v11 }
  0x9e   : > { %v664_v4 = vld [vmem:[#allocation2 + $0x40] sm:$0xf]  ;;  %v663_v5 = vld [vmem:[#allocation2 + $0x88] sm:$0xf]  ;;  %593 = vst [vmem:[#allocation2 + $0x70] sm:$0xf] %v591_v1 }
  0x9f   : > { %594 = vst [vmem:[#allocation2 + $0x80] sm:$0xf] %v592_v2  ;;  %1381 = vmatprep.subr.msk.mxu0 %vm2202_vm4, %v664_v4  ;;  %v508_v14 = vpop.permute.xlu1 %507  ;;  %v505_v15 = vpop.permute.xlu0 %504  ;;  %v432_v28 = vsel %vm431_vm10, 1, %v1528_v0  ;;  %vm2207_vm3 = vcmask 121856   ;;  %vm1834_vm15 = vcmp.eq.s32.totalorder %v493_v20, 1  ;;  %v2259_v39 = vmov 0 }
  0xa0   : > { %1382 = vmatpush1.msk.msra.mxu0 %vm2202_vm4, %v663_v5  ;;  %v510_v16 = vsel %vm2204_vm9, %v508_v14, %v505_v15  ;;  %v513_v17 = vsel %vm2204_vm9, %v505_v15, %v508_v14  ;;  %vm1823_vm4 = vcmp.eq.s32.totalorder %v465_v12, 1  ;;  %v2260_v39 = vsel %vm1834_vm15, 4294967295, %v2259_v39  ;;  %v652_v2 = vld [vmem:[%s2172_s3] sm:$0xff] }
  0xa1   : > { %v525_v18 = vsel %vm1788_vm5, %v513_v17, 0.0  ;;  %v526_v19 = vsel %vm1797_vm1, %v510_v16, 0.0  ;;  %v2258_v7 = vsel %vm1823_vm4, 4294967295, %v2257_v7  ;;  %vm1838_vm10 = vcmp.eq.s32.totalorder %v497_v21, 1  ;;  %v1017_v20 = vld [vmem:[%s2176_s7] sm:$0xf] }
  0xa2   : > { %v529_v24 = vrot.slane %v525_v18, 4  ;;  %v530_v25 = vrot.slane %v526_v19, 4  ;;  %v2261_v0 = vmov 0  ;;  %v436_v44 = vrot.slane %v432_v28, %v1698_v10  ;;  %v653_v19 = vld [vmem:[%s2172_s3 + $0x8] sm:$0xff]  ;;  %v1025_v21 = vld [vmem:[%s2177_s8] sm:$0xf] }
  0xa3   : > { %v451_v6 = vpop.permute.xlu1 %450  ;;  %v448_v27 = vpop.permute.xlu0 %447  ;;  %v2262_v0 = vsel %vm1838_vm10, 4294967295, %v2261_v0  ;;  %v440_v45 = vrot.slane %v432_v28, %v1700_v11  ;;  %v660_v48 = vld [vmem:[#allocation2 + $0x8] sm:$0xff]  ;;  %v659_v51 = vld [vmem:[#allocation2 + $0x20] sm:$0xff]  ;;  %v2263_v11 = vmov 0  ;;  %v2265_v53 = vmov 0 }
  0xa4   : > { %533 = vst [vmem:[#allocation2 + $0x78] sm:$0xf0] %v529_v24  ;;  %534 = vst [vmem:[#allocation2 + $0x58] sm:$0xf0] %v530_v25  ;;  %v453_v29 = vsel %vm2203_vm11, %v451_v6, %v448_v27  ;;  %v456_v30 = vsel %vm2203_vm11, %v448_v27, %v451_v6  ;;  %vm2211_vm11 = vcmask 138240   ;;  %vm1850_vm9 = vcmp.eq.s32.totalorder %v436_v44, 1 }
  0xa5   : > { %v468_v31 = vsel %vm1819_vm8, %v456_v30, 0.0  ;;  %v469_v32 = vsel %vm1823_vm4, %v453_v29, 0.0  ;;  %v661_v34 = vld [vmem:[#allocation2 + $0x70] sm:$0xff]  ;;  %v2264_v11 = vsel %vm1850_vm9, 4294967295, %v2263_v11  ;;  %vm1854_vm4 = vcmp.eq.s32.totalorder %v440_v45, 1 }
  0xa6   : > { %v662_v33 = vld [vmem:[#allocation2 + $0x80] sm:$0xff]  ;;  %v472_v40 = vrot.slane %v468_v31, 4  ;;  %v473_v43 = vrot.slane %v469_v32, 4  ;;  %v2266_v53 = vsel %vm1854_vm4, 4294967295, %v2265_v53  ;;  %v654_v24 = vld [vmem:[%s2172_s3 + $0x10] sm:$0xff] }
  0xa7   : > { %706 = vmatprep.subr.mxu0 %v662_v33  ;;  %v482_v46 = vpop.permute.xlu1 %481  ;;  %v479_v47 = vpop.permute.xlu0 %478 }
  0xa8   : > { %707 = vmatpush1.msra.mxu0 %v661_v34  ;;  %476 = vst [vmem:[#allocation2] sm:$0xf0] %v472_v40  ;;  %477 = vst [vmem:[#allocation2 + $0x38] sm:$0xf0] %v473_v43  ;;  %v484_v49 = vsel %vm2207_vm3, %v482_v46, %v479_v47  ;;  %v487_v50 = vsel %vm2207_vm3, %v479_v47, %v482_v46  ;;  %vm2216_vm3 = vcmask 293888  }
  0xa9   : > { %708 = vmatprep.subr.mxu0 %v660_v48  ;;  %v500_v52 = vsel %vm1834_vm15, %v487_v50, 0.0  ;;  %v501_v10 = vsel %vm1838_vm10, %v484_v49, 0.0 }
  0xaa   : > { %709 = vmatpush1.msra.mxu0 %v659_v51  ;;  %502 = vst [vmem:[#allocation2 + $0x78] sm:$0xf] %v500_v52  ;;  %503 = vst [vmem:[#allocation2 + $0x58] sm:$0xf] %v501_v10 }
  0xab   : > { %v425_v54 = vpop.permute.xlu1 %424  ;;  %v422_v55 = vpop.permute.xlu0 %421 }
  0xac   : > { %v427_v56 = vsel %vm2211_vm11, %v425_v54, %v422_v55  ;;  %v430_v57 = vsel %vm2211_vm11, %v422_v55, %v425_v54  ;;  %vm2275_vm11 = vcmask 908288  }
  0xad   : > { %v443_v58 = vsel %vm1850_vm9, %v430_v57, 0.0  ;;  %v444_v59 = vsel %vm1854_vm4, %v427_v56, 0.0  ;;  %vm2276_vm4 = vmmov %vm2275_vm11  ;;  %vm2277_vm9 = vcmask 916480  }
  0xae   : > { %445 = vst [vmem:[#allocation2] sm:$0xf] %v443_v58  ;;  %446 = vst [vmem:[#allocation2 + $0x38] sm:$0xf] %v444_v59 }
  0xb1   : > { %v658_v60 = vld [vmem:[#allocation2 + $0x58] sm:$0xff] }
  0xb2   : > { %v657_v61 = vld [vmem:[#allocation2 + $0x78] sm:$0xff]  ;;  %710 = vmatprep.subr.mxu0 %v658_v60 }
  0xb3   : > { %711 = vmatpush1.msra.mxu0 %v657_v61 }
  0xb5   : > { %v656_v62 = vld [vmem:[#allocation2 + $0x38] sm:$0xff]  ;;  %v655_v1 = vld [vmem:[#allocation2] sm:$0xff] }
  0xb6   : > { %712 = vmatprep.subr.mxu0 %v656_v62 }
  0xb7   : > { %713 = vmatpush1.msra.mxu0 %v655_v1 }
  0xb8   : > { %1383 = vmatmul.mubr.msk.f32.vlgmr.msra.gmra.mxu0 %vm2216_vm3, %v652_v2  ;;  %v771_v4 = vpop.permute.xlu0 %770  ;;  %v795_v9 = vpop.permute.xlu1 %794 }
  0xb9   : > { %752 = vmatprep.mubr.f32.mxu0 %v1536_v3 }
  0xbc   : > { %1384 = vmatmul.mubr.msk.f32.gmra.mxu0 %vm2216_vm3, %v653_v19 }
  0xbd   : > { %758 = vmatprep.mubr.f32.mxu0 %v1536_v3 }
  0xc0   : > { %1385 = vmatmul.mubr.msk.f32.gmra.mxu0 %vm2216_vm3, %v654_v24  ;;  %vm2278_vm3 = vmmov %vm2277_vm9 }
  0xc1   : > { %1251 = vmatprep.mubr.f32.mxu0 %v1536_v3 }
 0x178   : > { %v748_v5 = vpop.f32.mrf.mxu0 }
 0x179   : > { %v783_v12 = vmul.f32 %v771_v4, %v748_v5 }
 0x17a   : > { %v750_v13 = vpop.f32.mrf.mxu0 }
 0x17b   : > { %v807_v14 = vadd.f32 %v795_v9, %v783_v12  ;;  %v784_v15 = vmul.f32 %v771_v4, %v750_v13 }
 0x17d   : > { %v1869_v16 = vmax.f32 %v807_v14, 0.0  ;;  %v808_v17 = vadd.f32 %v795_v9, %v784_v15  ;;  %v923_v15 = vld [vmem:[%s2175_s6] sm:$0xf] }
 0x17f   : > { %869 = vst [vmem:[#allocation2 + $0x88] sm:$0xff] %v1869_v16  ;;  %v1872_v18 = vmax.f32 %v808_v17, 0.0  ;;  %859 = vrot.lane.b32.xlu0 %v1869_v16, %s2267_s28  ;;  %910 = vrot.lane.b32.xlu1 %v1869_v16, %s2268_s29 }
 0x181   : > { %870 = vst [vmem:[#allocation2 + $0x40] sm:$0xff] %v1872_v18 }
 0x183   : > { %897 = vrot.lane.b32.xlu1 %v1869_v16, %s2269_s15  ;;  %912 = vrot.lane.b32.xlu0 %v1872_v18, %s2268_s29 }
 0x187   : > { %884 = vrot.lane.b32.xlu1 %v1869_v16, %s2270_s16  ;;  %899 = vrot.lane.b32.xlu0 %v1872_v18, %s2269_s15 }
 0x18b   : > { %871 = vrot.lane.b32.xlu1 %v1869_v16, %s2271_s17  ;;  %886 = vrot.lane.b32.xlu0 %v1872_v18, %s2270_s16 }
 0x18f   : > { %856 = vrot.lane.b32.xlu1 %v1872_v18, %s2267_s28  ;;  %873 = vrot.lane.b32.xlu0 %v1872_v18, %s2271_s17 }
 0x193   : > { %843 = vrot.lane.b32.xlu1 %v1872_v18, %s2272_s19  ;;  %846 = vrot.lane.b32.xlu0 %v1869_v16, %s2272_s19 }
 0x197   : > { %830 = vrot.lane.b32.xlu1 %v1872_v18, %s2273_s20  ;;  %833 = vrot.lane.b32.xlu0 %v1869_v16, %s2273_s20 }
 0x19b   : > { %816 = vrot.lane.b32.xlu1 %v1872_v18, %s2274_s0  ;;  %820 = vrot.lane.b32.xlu0 %v1869_v16, %s2274_s0 }
 0x19f   : > { %1020 = vperm.xlu1 %1448, %v1017_v20   ;;  %1028 = vperm.xlu0 %1447, %v1025_v21  }
 0x1f1   : > { %v860_v25 = vpop.permute.xlu0 %859  ;;  %v911_v6 = vpop.permute.xlu1 %910 }
 0x1f5   : > { %v898_v27 = vpop.permute.xlu1 %897  ;;  %v913_v28 = vpop.permute.xlu0 %912 }
 0x1f6   : > { %v914_v29 = vsel %vm2275_vm11, %v911_v6, %v913_v28  ;;  %v918_v30 = vsel %vm2276_vm4, %v913_v28, %v911_v6  ;;  %vm2279_vm11 = vcmask 924672  }
 0x1f7   : > { %1450 = vmatprep.subr.msk.mxu1 %vm1719_vm7, %v918_v30  ;;  %vm2280_vm4 = vmmov %vm2279_vm11  ;;  %vm2283_vm7 = vcmask 1039360   ;;  %v767_v30 = vld [vmem:[%s2173_s4 + $0x10] sm:$0xff] }
 0x1f8   : > { %1451 = vmatpush1.msk.msra.mxu1 %vm1715_vm6, %v914_v29  ;;  %vm2284_vm6 = vmmov %vm2283_vm7 }
 0x1f9   : > { %v885_v31 = vpop.permute.xlu1 %884  ;;  %v900_v32 = vpop.permute.xlu0 %899 }
 0x1fa   : > { %v901_v33 = vsel %vm2277_vm9, %v898_v27, %v900_v32  ;;  %v905_v3 = vsel %vm2278_vm3, %v900_v32, %v898_v27  ;;  %vm2281_vm9 = vcmask 7168   ;;  %v1258_v32 = vld [vmem:[%s2179_s10] sm:$0xf] }
 0x1fb   : > { %1452 = vmatprep.subr.msk.mxu1 %vm1748_vm14, %v905_v3  ;;  %vm2282_vm3 = vmmov %vm2281_vm9  ;;  %v1266_v3 = vld [vmem:[%s2180_s11] sm:$0xf] }
 0x1fc   : > { %1453 = vmatpush1.msk.msra.mxu1 %vm1744_vm13, %v901_v33  ;;  %v766_v33 = vld [vmem:[%s2173_s4 + $0x8] sm:$0xff] }
 0x1fd   : > { %v872_v34 = vpop.permute.xlu1 %871  ;;  %v887_v40 = vpop.permute.xlu0 %886 }
 0x1fe   : > { %v888_v43 = vsel %vm2279_vm11, %v885_v31, %v887_v40  ;;  %v892_v44 = vsel %vm2280_vm4, %v887_v40, %v885_v31  ;;  %vm2285_vm11 = vnez %v2238_v35  ;;  %vm2286_vm4 = vcmask 121856   ;;  %v791_v31 = vld [vmem:[%s2174_s5 + $0x10] sm:$0xff] }
 0x1ff   : > { %1454 = vmatprep.subr.msk.mxu1 %vm1757_vm2, %v892_v44 }
 0x200   : > { %1455 = vmatpush1.msk.msra.mxu1 %vm1753_vm0, %v888_v43 }
 0x201   : > { %v857_v45 = vpop.permute.xlu1 %856  ;;  %v874_v46 = vpop.permute.xlu0 %873 }
 0x202   : > { %v861_v47 = vsel %vm2281_vm9, %v860_v25, %v857_v45  ;;  %v864_v48 = vsel %vm2282_vm3, %v857_v45, %v860_v25  ;;  %v875_v49 = vsel %vm2283_vm7, %v872_v34, %v874_v46  ;;  %v879_v50 = vsel %vm2284_vm6, %v874_v46, %v872_v34  ;;  %vm2287_vm7 = vmmov %vm2286_vm4  ;;  %v790_v34 = vld [vmem:[%s2174_s5 + $0x8] sm:$0xff] }
 0x203   : > { %v865_v51 = vsel %vm1788_vm5, %v864_v48, 0.0  ;;  %v866_v52 = vsel %vm1797_vm1, %v861_v47, 0.0  ;;  %1456 = vmatprep.subr.msk.mxu1 %vm1740_vm12, %v879_v50  ;;  %vm2288_vm6 = vcmask 130048   ;;  %vm2290_vm3 = vnez %v2258_v7 }
 0x204   : > { %867 = vst [vmem:[#allocation2 + $0x70] sm:$0xff] %v865_v51  ;;  %868 = vst [vmem:[#allocation2 + $0x80] sm:$0xff] %v866_v52  ;;  %1457 = vmatpush1.msk.msra.mxu1 %vm2285_vm11, %v875_v49 }
 0x205   : > { %v844_v10 = vpop.permute.xlu1 %843  ;;  %v847_v54 = vpop.permute.xlu0 %846  ;;  %968 = vmatprep.subr.mxu1 %v1872_v18  ;;  %vm2289_vm9 = vmmov %vm2288_vm6 }
 0x206   : > { %v848_v55 = vsel %vm2286_vm4, %v847_v54, %v844_v10  ;;  %v851_v56 = vsel %vm2287_vm7, %v844_v10, %v847_v54  ;;  %969 = vmatpush1.msra.mxu1 %v1869_v16  ;;  %vm2291_vm4 = vcmask 138240  }
 0x207   : > { %v852_v57 = vsel %vm1834_vm15, %v851_v56, 0.0  ;;  %v853_v58 = vsel %vm1838_vm10, %v848_v55, 0.0  ;;  %1458 = vmatprep.subr.msk.mxu1 %vm1797_vm1, %v861_v47  ;;  %vm2292_vm7 = vmmov %vm2291_vm4 }
 0x208   : > { %854 = vst [vmem:[#allocation2 + $0x20] sm:$0xff] %v852_v57  ;;  %855 = vst [vmem:[#allocation2 + $0x8] sm:$0xff] %v853_v58  ;;  %1459 = vmatpush1.msk.msra.mxu1 %vm1788_vm5, %v864_v48 }
 0x209   : > { %v831_v59 = vpop.permute.xlu1 %830  ;;  %v834_v60 = vpop.permute.xlu0 %833  ;;  %1460 = vmatprep.subr.msk.mxu1 %vm1838_vm10, %v848_v55  ;;  %vm942_vm10 = vcmask 588800  }
 0x20a   : > { %v835_v61 = vsel %vm2288_vm6, %v834_v60, %v831_v59  ;;  %v838_v62 = vsel %vm2289_vm9, %v831_v59, %v834_v60  ;;  %1461 = vmatpush1.msk.msra.mxu1 %vm1834_vm15, %v851_v56  ;;  %vm2293_vm6 = vnez %v2264_v11  ;;  %vm2294_vm9 = vnez %v2266_v53 }
 0x20b   : > { %v839_v1 = vsel %vm1819_vm8, %v838_v62, 0.0  ;;  %v840_v2 = vsel %vm2290_vm3, %v835_v61, 0.0  ;;  %1462 = vmatprep.subr.msk.mxu1 %vm2290_vm3, %v835_v61 }
 0x20c   : > { %841 = vst [vmem:[#allocation2 + $0x78] sm:$0xff] %v839_v1  ;;  %842 = vst [vmem:[#allocation2 + $0x58] sm:$0xff] %v840_v2  ;;  %1463 = vmatpush1.msk.msra.mxu1 %vm1819_vm8, %v838_v62 }
 0x20d   : > { %v817_v4 = vpop.permute.xlu1 %816  ;;  %v821_v5 = vpop.permute.xlu0 %820 }
 0x20e   : > { %v822_v9 = vsel %vm2291_vm4, %v821_v5, %v817_v4  ;;  %v825_v12 = vsel %vm2292_vm7, %v817_v4, %v821_v5  ;;  %vm2297_vm7 = vcmask 908288  }
 0x20f   : > { %v826_v13 = vsel %vm2293_vm6, %v825_v12, 0.0  ;;  %v827_v14 = vsel %vm2294_vm9, %v822_v9, 0.0  ;;  %1464 = vmatprep.subr.msk.mxu1 %vm2294_vm9, %v822_v9  ;;  %vm2298_vm9 = vmmov %vm2297_vm7 }
 0x210   : > { %828 = vst [vmem:[#allocation2] sm:$0xff] %v826_v13  ;;  %829 = vst [vmem:[#allocation2 + $0x38] sm:$0xff] %v827_v14  ;;  %1465 = vmatpush1.msk.msra.mxu1 %vm2293_vm6, %v825_v12  ;;  %vm2303_vm6 = vcmask 1039360  }
 0x211   : > { %1386 = vmatmul.mubr.msk.f32.vlgmr.msra.gmra.mxu1 %vm942_vm10, %v923_v15  ;;  %vm2295_vm10 = vcmask 916480   ;;  %vm2304_vm15 = vmmov %vm2303_vm6 }
 0x212   : > { %vm2296_vm4 = vmmov %vm2295_vm10 }
 0x21a   : > { %v1021_v17 = vpop.permute.xlu1 %1020  ;;  %v1029_v21 = vpop.permute.xlu0 %1028 }
 0x2d1   : > { %v1012_v19 = vpop.f32.mrf.mxu1 }
 0x2d2   : > { %v1023_v20 = vmul.f32 %v1021_v17, %v1012_v19 }
 0x2d3   : > { %v1014_v24 = vpop.f32.mrf.mxu1 }
 0x2d4   : > { %v1031_v25 = vadd.f32 %v1029_v21, %v1023_v20  ;;  %v1024_v6 = vmul.f32 %v1021_v17, %v1014_v24 }
 0x2d6   : > { %v1992_v27 = vmax.f32 %v1031_v25, 0.0  ;;  %v1032_v28 = vadd.f32 %v1029_v21, %v1024_v6 }
 0x2d8   : > { %1101 = vst [vmem:[#allocation2 + $0x20] sm:$0xf] %v1992_v27  ;;  %v1995_v29 = vmax.f32 %v1032_v28, 0.0  ;;  %1085 = vrot.lane.b32.xlu0 %v1992_v27, %s2267_s28  ;;  %1135 = vrot.lane.b32.xlu1 %v1992_v27, %s2269_s15 }
 0x2da   : > { %1102 = vst [vmem:[#allocation2 + $0x8] sm:$0xf] %v1995_v29 }
 0x2dc   : > { %1053 = vrot.lane.b32.xlu0 %v1992_v27, %s2273_s20  ;;  %1154 = vrot.lane.b32.xlu1 %v1992_v27, %s2268_s29 }
 0x2e0   : > { %1103 = vrot.lane.b32.xlu1 %v1992_v27, %s2271_s17  ;;  %1137 = vrot.lane.b32.xlu0 %v1995_v29, %s2269_s15  ;;  %s1396_s15 = sshll.u32 %s1626_s25, 9 }
 0x2e4   : > { %1122 = vrot.lane.b32.xlu1 %v1992_v27, %s2270_s16  ;;  %1156 = vrot.lane.b32.xlu0 %v1995_v29, %s2268_s29 }
 0x2e8   : > { %1082 = vrot.lane.b32.xlu1 %v1995_v29, %s2267_s28  ;;  %1105 = vrot.lane.b32.xlu0 %v1995_v29, %s2271_s17  ;;  %s1378_s28 = sshll.u32 %s404_s30, 5 }
 0x2e9   : > { %s2107_s29 = scalar_lea.vmem [#allocation3], %s1378_s28 }
 0x2ec   : > { %1050 = vrot.lane.b32.xlu1 %v1995_v29, %s2273_s20  ;;  %1124 = vrot.lane.b32.xlu0 %v1995_v29, %s2270_s16  ;;  %s1312_s16 = sshll.u32 %s2107_s29, 4  ;;  %s2123_s16 = int_to_ptr.vmem [resolvable:$true] %s1312_s16 }
 0x2ed   : > { %s1466_s25 = scalar_lea.vmem %s2123_s16, 512  ;;  %p1473_p0 = scmp.lt.s32.totalorder %s2123_s16, %s1471_s1 }
 0x2ee   : > { %p1467_p11 = scmp.ne.s32.totalorder %s2123_s16, %s1466_s25  ;;  %p1474_p1 = scmp.lt.s32.totalorder %s1472_s2, %s1466_s25 }
 0x2f0   : > { %1069 = vrot.lane.b32.xlu1 %v1995_v29, %s2272_s19  ;;  %1072 = vrot.lane.b32.xlu0 %v1992_v27, %s2272_s19  ;;  %p1468_p12 = pnand %p1467_p11, %p1643_p5  ;;  %p1475_p2 = por %p1474_p1, %p1473_p0 }
 0x2f2   : > { %p1469_p13 = pneg %p1468_p12 }
 0x2f4   : > { %1036 = vrot.lane.b32.xlu1 %v1995_v29, %s2274_s0  ;;  %1040 = vrot.lane.b32.xlu0 %v1992_v27, %s2274_s0  ;;  %s2120_s0 = scalar_lea.hbm %s2181_s12, %s1396_s15  ;;  %p1476_p3 = pnand %p1475_p2, %p1469_p13 }
 0x2f8   : > { %780 = vperm.xlu1 %1448, %v767_v30   ;;  %804 = vperm.xlu0 %1447, %v791_v31  }
 0x2fc   : > { %1261 = vperm.xlu1 %1448, %v1258_v32   ;;  %775 = vperm.xlu0 %1447, %v766_v33   ;;  %v754_v32 = vpop.f32.mrf.mxu0 }
 0x300   : > { %1269 = vperm.xlu1 %1448, %v1266_v3   ;;  %799 = vperm.xlu0 %1447, %v790_v34  }
 0x34a   : > { %v1086_v40 = vpop.permute.xlu0 %1085  ;;  %v1136_v43 = vpop.permute.xlu1 %1135 }
 0x34e   : > { %v1054_v44 = vpop.permute.xlu0 %1053  ;;  %v1155_v45 = vpop.permute.xlu1 %1154 }
 0x352   : > { %v1104_v46 = vpop.permute.xlu1 %1103  ;;  %v1138_v47 = vpop.permute.xlu0 %1137 }
 0x353   : > { %v1139_v48 = vsel %vm2295_vm10, %v1136_v43, %v1138_v47  ;;  %v1143_v49 = vsel %vm2296_vm4, %v1138_v47, %v1136_v43  ;;  %vm2299_vm10 = vnez %v2234_v22  ;;  %vm2300_vm4 = vnez %v2236_v23 }
 0x354   : > { %v1144_v50 = vsel %vm1744_vm13, %v1139_v48, 0.0  ;;  %v1145_v51 = vsel %vm1748_vm14, %v1143_v49, 0.0  ;;  %vm2301_vm13 = vcmask 7168  }
 0x355   : > { %v1148_v52 = vrot.slane %v1144_v50, 4  ;;  %v1149_v10 = vrot.slane %v1145_v51, 4  ;;  %vm2302_vm14 = vmmov %vm2301_vm13  ;;  %v1167_v51 = vld [vmem:[%s2178_s9] sm:$0xf] }
 0x356   : > { %v1123_v54 = vpop.permute.xlu1 %1122  ;;  %v1157_v55 = vpop.permute.xlu0 %1156 }
 0x357   : > { %1152 = vst [vmem:[#allocation2 + $0x70] sm:$0xf0] %v1148_v52  ;;  %1153 = vst [vmem:[#allocation2 + $0x80] sm:$0xf0] %v1149_v10  ;;  %v1158_v56 = vsel %vm2297_vm7, %v1155_v45, %v1157_v55  ;;  %v1162_v57 = vsel %vm2298_vm9, %v1157_v55, %v1155_v45  ;;  %vm2315_vm9 = vcmask 138240  }
 0x358   : > { %v1163_v58 = vsel %vm2299_vm10, %v1158_v56, 0.0  ;;  %v1164_v37 = vsel %vm2300_vm4, %v1162_v57, 0.0  ;;  %vm2316_vm7 = vmmov %vm2315_vm9  ;;  %vm2317_vm10 = vnez %v2264_v11  ;;  %vm2318_vm4 = vnez %v2266_v53 }
 0x359   : > { %1165 = vst [vmem:[#allocation2 + $0x88] sm:$0xf] %v1163_v58  ;;  %1166 = vst [vmem:[#allocation2 + $0x40] sm:$0xf] %v1164_v37 }
 0x35a   : > { %v1083_v38 = vpop.permute.xlu1 %1082  ;;  %v1106_v59 = vpop.permute.xlu0 %1105 }
 0x35b   : > { %v1087_v60 = vsel %vm2301_vm13, %v1086_v40, %v1083_v38  ;;  %v1090_v61 = vsel %vm2302_vm14, %v1083_v38, %v1086_v40  ;;  %v1107_v62 = vsel %vm2303_vm6, %v1104_v46, %v1106_v59  ;;  %v1111_v1 = vsel %vm2304_vm15, %v1106_v59, %v1104_v46 }
 0x35c   : > { %v1091_v2 = vsel %vm1788_vm5, %v1090_v61, 0.0  ;;  %v1092_v22 = vsel %vm1797_vm1, %v1087_v60, 0.0  ;;  %v1112_v23 = vsel %vm2285_vm11, %v1107_v62, 0.0  ;;  %v1113_v4 = vsel %vm1740_vm12, %v1111_v1, 0.0 }
 0x35d   : > { %v1095_v5 = vrot.slane %v1091_v2, 4  ;;  %v1096_v9 = vrot.slane %v1092_v22, 4  ;;  %v1116_v12 = vrot.slane %v1112_v23, 4  ;;  %v1117_v13 = vrot.slane %v1113_v4, 4 }
 0x35e   : > { %v1051_v14 = vpop.permute.xlu1 %1050  ;;  %v1125_v15 = vpop.permute.xlu0 %1124  ;;  %vm2305_vm5 = vcmask 130048   ;;  %vm2307_vm1 = vcmask 924672   ;;  %vm2309_vm12 = vcmask 1043456   ;;  %vm2319_vm13 = vcmask 293888  }
 0x35f   : > { %1099 = vst [vmem:[#allocation2 + $0x78] sm:$0xf0] %v1095_v5  ;;  %1100 = vst [vmem:[#allocation2 + $0x58] sm:$0xf0] %v1096_v9  ;;  %v1055_v63 = vsel %vm2305_vm5, %v1054_v44, %v1051_v14  ;;  %v1126_v35 = vsel %vm2307_vm1, %v1123_v54, %v1125_v15 }
 0x360   : > { %1120 = vst [vmem:[#allocation2 + $0x20] sm:$0xf0] %v1116_v12  ;;  %1121 = vst [vmem:[#allocation2 + $0x8] sm:$0xf0] %v1117_v13  ;;  %v1060_v19 = vsel %vm2290_vm3, %v1055_v63, 0.0  ;;  %v1131_v20 = vsel %vm1753_vm0, %v1126_v35, 0.0  ;;  %vm2314_vm3 = vnez %v2262_v0  ;;  %v756_v0 = vpop.f32.mrf.mxu0 }
 0x361   : > { %vm2306_vm15 = vmmov %vm2305_vm5  ;;  %v1177_v24 = vld [vmem:[#allocation2 + $0x40] sm:$0xf]  ;;  %v1064_v6 = vrot.slane %v1060_v19, 4  ;;  %1133 = vst [vmem:[#allocation2 + $0x70] sm:$0xf] %v1131_v20 }
 0x362   : > { %v1058_v8 = vsel %vm2306_vm15, %v1051_v14, %v1054_v44  ;;  %vm2308_vm11 = vmmov %vm2307_vm1  ;;  %1387 = vmatprep.subr.msk.mxu0 %vm2309_vm12, %v1177_v24  ;;  %v1176_v28 = vld [vmem:[#allocation2 + $0x88] sm:$0xf]  ;;  %v1070_v30 = vpop.permute.xlu1 %1069  ;;  %v1073_v26 = vpop.permute.xlu0 %1072 }
 0x363   : > { %v1130_v17 = vsel %vm2308_vm11, %v1125_v15, %v1123_v54  ;;  %v1059_v36 = vsel %vm1819_vm8, %v1058_v8, 0.0  ;;  %vm2310_vm6 = vmmov %vm2309_vm12  ;;  %1068 = vst [vmem:[#allocation2 + $0x38] sm:$0xf0] %v1064_v6  ;;  %vm2311_vm8 = vcmask 121856   ;;  %v760_v11 = vpop.f32.mrf.mxu0 }
 0x364   : > { %v1132_v21 = vsel %vm1757_vm2, %v1130_v17, 0.0  ;;  %v1063_v25 = vrot.slane %v1059_v36, 4  ;;  %1388 = vmatpush1.msk.msra.mxu0 %vm2310_vm6, %v1176_v28  ;;  %v1074_v41 = vsel %vm2311_vm8, %v1073_v26, %v1070_v30  ;;  %vm2312_vm0 = vmmov %vm2311_vm8  ;;  %vm2313_vm2 = vnez %v2260_v39 }
 0x365   : > { %1134 = vst [vmem:[#allocation2 + $0x80] sm:$0xf] %v1132_v21  ;;  %v1077_v7 = vsel %vm2312_vm0, %v1070_v30, %v1073_v26  ;;  %v1079_v31 = vsel %vm2314_vm3, %v1074_v41, 0.0  ;;  %v762_v52 = vpop.f32.mrf.mxu0 }
 0x366   : > { %1067 = vst [vmem:[#allocation2] sm:$0xf0] %v1063_v25  ;;  %v1078_v42 = vsel %vm2313_vm2, %v1077_v7, 0.0  ;;  %1081 = vst [vmem:[#allocation2 + $0x58] sm:$0xf] %v1079_v31  ;;  %v1037_v33 = vpop.permute.xlu1 %1036  ;;  %v1041_v3 = vpop.permute.xlu0 %1040 }
 0x367   : > { %1080 = vst [vmem:[#allocation2 + $0x78] sm:$0xf] %v1078_v42  ;;  %v1042_v34 = vsel %vm2315_vm9, %v1041_v3, %v1037_v33  ;;  %v1045_v40 = vsel %vm2316_vm7, %v1037_v33, %v1041_v3  ;;  %v1173_v46 = vld [vmem:[#allocation2 + $0x8] sm:$0xff]  ;;  %v1172_v47 = vld [vmem:[#allocation2 + $0x20] sm:$0xff] }
 0x368   : > { %v1046_v43 = vsel %vm2317_vm10, %v1045_v40, 0.0  ;;  %v1047_v44 = vsel %vm2318_vm4, %v1042_v34, 0.0  ;;  %v1174_v45 = vld [vmem:[#allocation2 + $0x70] sm:$0xff] }
 0x369   : > { %1048 = vst [vmem:[#allocation2] sm:$0xf] %v1046_v43  ;;  %1049 = vst [vmem:[#allocation2 + $0x38] sm:$0xf] %v1047_v44 }
 0x36c   : > { %v1175_v39 = vld [vmem:[#allocation2 + $0x80] sm:$0xff] }
 0x36d   : > { %1211 = vmatprep.subr.mxu0 %v1175_v39  ;;  %v1171_v48 = vld [vmem:[#allocation2 + $0x58] sm:$0xff] }
 0x36e   : > { %1212 = vmatpush1.msra.mxu0 %v1174_v45  ;;  %v1170_v49 = vld [vmem:[#allocation2 + $0x78] sm:$0xff] }
 0x36f   : > { %1213 = vmatprep.subr.mxu0 %v1173_v46 }
 0x370   : > { %1214 = vmatpush1.msra.mxu0 %v1172_v47  ;;  %v1169_v53 = vld [vmem:[#allocation2 + $0x38] sm:$0xff]  ;;  %v1168_v50 = vld [vmem:[#allocation2] sm:$0xff] }
 0x371   : > { %1215 = vmatprep.subr.mxu0 %v1171_v48 }
 0x372   : > { %1216 = vmatpush1.msra.mxu0 %v1170_v49 }
 0x373   : > { %1217 = vmatprep.subr.mxu0 %v1169_v53  ;;  %v781_v10 = vpop.permute.xlu1 %780  ;;  %v805_v54 = vpop.permute.xlu0 %804 }
 0x374   : > { %1218 = vmatpush1.msra.mxu0 %v1168_v50  ;;  %v787_v55 = vmul.f32 %v781_v10, %v760_v11  ;;  %v788_v56 = vmul.f32 %v781_v10, %v762_v52 }
 0x375   : > { %1389 = vmatmul.mubr.msk.f32.vlgmr.msra.gmra.mxu0 %vm2319_vm13, %v1167_v51 }
 0x376   : > { %v811_v57 = vadd.f32 %v805_v54, %v787_v55  ;;  %v812_v58 = vadd.f32 %v805_v54, %v788_v56 }
 0x377   : > { %v776_v37 = vpop.permute.xlu0 %775 }
 0x378   : > { %v1278_v38 = vadd.f32 %v1992_v27, %v811_v57  ;;  %v1279_v59 = vadd.f32 %v1995_v29, %v812_v58  ;;  %v785_v60 = vmul.f32 %v776_v37, %v754_v32  ;;  %v786_v61 = vmul.f32 %v776_v37, %v756_v0  ;;  %v1262_v29 = vpop.permute.xlu1 %1261 }
 0x379   : > { %v1284_v12 = vrot.slane %v811_v57, 4  ;;  %v1285_v15 = vrot.slane %v812_v58, 4 }
 0x37a   : > { %1280 = vst [vmem:[%s2107_s29 + $0x10] sm:$0xf] %v1278_v38  ;;  %1281 = vst [vmem:[%s2107_s29 + $0x18] sm:$0xf] %v1279_v59 }
 0x37b   : > { %v800_v62 = vpop.permute.xlu0 %799 }
 0x37c   : > { %v809_v1 = vadd.f32 %v800_v62, %v785_v60  ;;  %v810_v2 = vadd.f32 %v800_v62, %v786_v61  ;;  %v1270_v5 = vpop.permute.xlu1 %1269 }
 0x37e   : > { %v1274_v22 = vadd.f32 %v1869_v16, %v809_v1  ;;  %v1275_v27 = vadd.f32 %v1872_v18, %v810_v2 }
 0x380   : > { %1276 = vst [vmem:[%s2107_s29] sm:$0xff] %v1274_v22  ;;  %1277 = vst [vmem:[%s2107_s29 + $0x8] sm:$0xff] %v1275_v27 }
 0x435   : > { %v1253_v23 = vpop.f32.mrf.mxu0 }
 0x436   : > { %v1264_v4 = vmul.f32 %v1262_v29, %v1253_v23 }
 0x437   : > { %v1255_v9 = vpop.f32.mrf.mxu0 }
 0x438   : > { %v1272_v13 = vadd.f32 %v1270_v5, %v1264_v4  ;;  %v1265_v14 = vmul.f32 %v1262_v29, %v1255_v9 }
 0x43a   : > { %v1288_v63 = vadd.f32 %v1284_v12, %v1272_v13  ;;  %v1273_v16 = vadd.f32 %v1270_v5, %v1265_v14 }
 0x43c   : > { %v1292_v18 = vrot.slane %v1288_v63, 4  ;;  %v1289_v8 = vadd.f32 %v1285_v15, %v1273_v16 }
 0x43e   : > { %1296 = vst [vmem:[%s2107_s29 + $0x10] sm:$0xf0] %v1292_v18  ;;  %v1293_v35 = vrot.slane %v1289_v8, 4 }
 0x440   : > { %1297 = vst [vmem:[%s2107_s29 + $0x18] sm:$0xf0] %v1293_v35 }
 0x441   : > { %1479 = shalt.err (!%p1476_p3)
}
 0x442   : > { %s1480_s23 = scalar_lea.hbm %s2120_s0, 512  ;;  %s1484_s29 = scalar_lea.hbm %s2181_s12, 1024 }
 0x443   : > { %p1481_p4 = scmp.ne.s32.totalorder %s2120_s0, %s1480_s23  ;;  %p1485_p9 = scmp.lt.s32.totalorder %s2120_s0, %s2181_s12 }
 0x444   : > { %p1486_p10 = scmp.lt.s32.totalorder %s1484_s29, %s1480_s23 }
 0x445   : > { %p1482_p7 = pnand %p1481_p4, %p1643_p5 }
 0x446   : > { %p1487_p11 = por %p1486_p10, %p1485_p9 }
 0x447   : > { %p1483_p8 = pneg %p1482_p7 }
 0x449   : > { %p1488_p12 = pnand %p1487_p11, %p1483_p8 }
 0x44b   : > { %1491 = shalt.err (!%p1488_p12)
}
 0x44c   : > { %s1539_s19 = smov 256  }
 0x44d   : > { %1397 = dma.vmem_to_hbm [thread:$0]  (%p1643_p5), %s2123_s16, 512, %s2120_s0, %s2128_s18, %s1539_s19, %s1539_s19, %s2273_s20  }
 0x44e PF: > { %p1403_p13 = scmp.ge.s32.totalorder %s1526_s24, 2  ;;  %s1327_s25 = sand.u32 1, %s1514_s21  }
 0x44f   : > { %s1328_s26 = scalar_lea.sflag [#allocation4], %s1327_s25 }
 0x450   : > { %p1400_p0 = pnand %p1403_p13, %p1647_p6 }
 0x452   : > { %p1401_p1 = pneg %p1400_p0 }
 0x454   : > { %1509 = dma.done.wait (%p1401_p1), %s1328_s26, 512  }
 0x455   : > { %1511 = vsyncadd (%p1401_p1), %s1328_s26, 4294966784  ;;  %s2320_s13 = sld [smem:[#allocation6_spill]]  ;;  %p22_p2 = scmp.ge.s32.totalorder %s1630_s27, 4  }
 0x456   : > { %s2321_s23 = sld [smem:[#allocation7_spill]]  ;;  %s2322_s21 = smov %s1518_s22 }
 0x457   : > { %s2324_s24 = smov %s1630_s27  ;;  %24 = sbr.rel (!%p22_p2) target bundleno = 7 (0x7), region = 103 }
 0x45b   : > { %s2323_s22 = smov %s2320_s13 }
 0x45c   :  { %1333 = vsyncpa [#allocation4], 1 }
 0x45d   :  { %1335 = vsyncpa [#allocation4 + $0x1], 1 }

</bundles_post_ra>
